<compile_context>
chip_gen: v5e
topology: v5e:2x2
jax: 0.10.0
libtpu: 0.0.40
codegen_flags: <defaults>
</compile_context>

<pallas_src>
import jax
import jax.numpy as jnp
from jax.experimental import pallas as pl
from jax.experimental.pallas import tpu as pltpu

EMBED_DIM = 128                       # embedding_dim in the PyTorch module
NUM_HEADS = 8
HEAD_SIZE = EMBED_DIM // NUM_HEADS    # 16
BLOCK_SIZE = 128                      # causal mask buffer size (T <= BLOCK_SIZE)


# --------------------------- fused attention kernel ---------------------------
def _fused_mha_kernel(x_ref, wqkv_ref, wp_ref, bp_ref, o_ref):
    """One batch element: fused QKV projection, 8-head causal attention,
    and output projection. Output block is lane-dense (T, C=128)."""
    T = x_ref.shape[1]
    C = x_ref.shape[2]
    hs = HEAD_SIZE
    scale = 1.0 / (hs ** 0.5)

    # ---- fused QKV projection: one (T, C) @ (C, 3C) matmul on the MXU (bf16) ----
    x_bf = x_ref[0].astype(jnp.bfloat16)                     # (T, C)
    wqkv_bf = wqkv_ref[...].astype(jnp.bfloat16)             # (C, 3C)
    qkv = jnp.dot(x_bf, wqkv_bf,
                  preferred_element_type=jnp.float32)        # (T, 3C) f32

    # ---- causal mask built once per kernel invocation (hoisted over heads) ----
    row = jax.lax.broadcasted_iota(jnp.int32, (T, T), 0)
    col = jax.lax.broadcasted_iota(jnp.int32, (T, T), 1)
    causal = col <= row                                      # (T, T) bool

    wp_bf = wp_ref[...].astype(jnp.bfloat16)                 # (C, C)

    # ---- per-head attention, accumulated directly into the projection output ----
    acc = jnp.zeros((T, C), jnp.float32)
    for h in range(NUM_HEADS):                               # static unroll (8 heads)
        q = qkv[:, h * hs:(h + 1) * hs]                      # (T, hs) f32
        k = qkv[:, C + h * hs:C + (h + 1) * hs]
        v = qkv[:, 2 * C + h * hs:2 * C + (h + 1) * hs]

        logits = jnp.dot(q.astype(jnp.bfloat16),
                         k.astype(jnp.bfloat16).T,
                         preferred_element_type=jnp.float32) * scale   # (T, T) f32
        logits = jnp.where(causal, logits, -jnp.inf)

        # softmax kept entirely in f32 (v5e VPU/EUP have no bf16 path)
        probs = jax.nn.softmax(logits, axis=-1)              # (T, T) f32

        head_out = jnp.dot(probs.astype(jnp.bfloat16),
                           v.astype(jnp.bfloat16),
                           preferred_element_type=jnp.float32)          # (T, hs)

        # fused output projection: accumulate this head's slice of Wp
        acc = acc + jnp.dot(head_out.astype(jnp.bfloat16),
                            wp_bf[h * hs:(h + 1) * hs, :],
                            preferred_element_type=jnp.float32)         # (T, C)

    o_ref[0] = (acc + bp_ref[...]).astype(o_ref.dtype)       # lane-dense (T, 128)


def fused_multi_head_attention(x, wqkv, wp, bp):
    """x: (B, T, C); wqkv: (C, 3C); wp: (C, C); bp: (1, C)  ->  (B, T, C)."""
    B, T, C = x.shape
    return pl.pallas_call(
        _fused_mha_kernel,
        out_shape=jax.ShapeDtypeStruct((B, T, C), jnp.float32),
        grid_spec=pltpu.PrefetchScalarGridSpec(
            num_scalar_prefetch=0,
            grid=(B,),
            in_specs=[
                pl.BlockSpec((1, T, C), lambda b: (b, 0, 0)),
                pl.BlockSpec((C, 3 * C), lambda b: (0, 0)),
                pl.BlockSpec((C, C), lambda b: (0, 0)),
                pl.BlockSpec((1, C), lambda b: (0, 0)),
            ],
            out_specs=pl.BlockSpec((1, T, C), lambda b: (b, 0, 0)),
        ),
        compiler_params=pltpu.CompilerParams(
            dimension_semantics=("parallel",)),
    )(x, wqkv, wp, bp)


# ------------------------------- full forward --------------------------------
@jax.jit
def multi_head_model_forward(x, wq, wk, wv, wp, bp):
    """wq/wk/wv: (H, C, hs) per-head weights; wp: (C, C); bp: (1, C)."""
    B, T, C = x.shape
    H, _, hs = wq.shape
    # Pack per-head Q/K/V weights into one (C, 3C) matrix so the kernel runs a
    # single full-width MXU matmul. Column layout: [q_h0..q_h7 | k_h0..k_h7 | v_h0..v_h7].
    q_all = jnp.transpose(wq, (1, 0, 2)).reshape(C, H * hs)
    k_all = jnp.transpose(wk, (1, 0, 2)).reshape(C, H * hs)
    v_all = jnp.transpose(wv, (1, 0, 2)).reshape(C, H * hs)
    wqkv = jnp.concatenate([q_all, k_all, v_all], axis=1)    # (C, 3C)
    return fused_multi_head_attention(x, wqkv, wp, bp)       # (B, T, C)


# -------------------------------- references ----------------------------------
def _reference_forward_f32(x, wq, wk, wv, wp, bp):
    """Pure-f32 reference, matches the PyTorch module in eval mode."""
    B, T, C = x.shape
    q = jnp.einsum("btc,hcs->bhts", x, wq)
    k = jnp.einsum("btc,hcs->bhts", x, wk)
    v = jnp.einsum("btc,hcs->bhts", x, wv)
    logits = jnp.einsum("bhts,bhus->bhtu", q, k) / (HEAD_SIZE ** 0.5)
    mask = jnp.tril(jnp.ones((T, T), dtype=bool))
    logits = jnp.where(mask, logits, -jnp.inf)
    probs = jax.nn.softmax(logits, axis=-1)
    out = jnp.einsum("bhtu,bhus->bhts", probs, v)
    concat = jnp.transpose(out, (0, 2, 1, 3)).reshape(B, T, C)
    return concat @ wp + bp


def _reference_forward_bf16(x, wq, wk, wv, wp, bp):
    """Reference mirroring the kernel's numerics (bf16 MXU operands, f32 accum)."""
    B, T, C = x.shape
    bf = jnp.bfloat16
    q = jnp.einsum("btc,hcs->bhts", x.astype(bf), wq.astype(bf),
                   preferred_element_type=jnp.float32)
    k = jnp.einsum("btc,hcs->bhts", x.astype(bf), wk.astype(bf),
                   preferred_element_type=jnp.float32)
    v = jnp.einsum("btc,hcs->bhts", x.astype(bf), wv.astype(bf),
                   preferred_element_type=jnp.float32)
    logits = jnp.einsum("bhts,bhus->bhtu", q.astype(bf), k.astype(bf),
                        preferred_element_type=jnp.float32) / (HEAD_SIZE ** 0.5)
    mask = jnp.tril(jnp.ones((T, T), dtype=bool))
    logits = jnp.where(mask, logits, -jnp.inf)
    probs = jax.nn.softmax(logits, axis=-1)
    out = jnp.einsum("bhtu,bhus->bhts", probs.astype(bf), v.astype(bf),
                     preferred_element_type=jnp.float32)
    concat = jnp.transpose(out, (0, 2, 1, 3)).reshape(B, T, C)
    proj = jnp.dot(concat.astype(bf), wp.astype(bf),
                   preferred_element_type=jnp.float32)
    return proj + bp


if __name__ == "__main__":
    B, T, C = 2, 8, EMBED_DIM   # small seq; embed dim fixed by the module

    key = jax.random.PRNGKey(0)
    kx, kq, kk, kv, kw, kb = jax.random.split(key, 6)

    x = jax.random.normal(kx, (B, T, C), dtype=jnp.float32)
    # per-head linear weights (no bias), stored (H, in, out) so y = x @ W
    wq = jax.random.normal(kq, (NUM_HEADS, C, HEAD_SIZE), dtype=jnp.float32) * 0.05
    wk = jax.random.normal(kk, (NUM_HEADS, C, HEAD_SIZE), dtype=jnp.float32) * 0.05
    wv = jax.random.normal(kv, (NUM_HEADS, C, HEAD_SIZE), dtype=jnp.float32) * 0.05
    # projection Linear(embedding_dim, embedding_dim) with bias, stored (in, out)
    wp = jax.random.normal(kw, (C, C), dtype=jnp.float32) * 0.05
    bp = jax.random.normal(kb, (1, C), dtype=jnp.float32) * 0.05

    out = multi_head_model_forward(x, wq, wk, wv, wp, bp)
    jax.block_until_ready(out)
    assert out.shape == (B, T, C)

    # Tight check against a reference that mirrors the kernel's bf16 MXU numerics.
    ref_bf16 = _reference_forward_bf16(x, wq, wk, wv, wp, bp)
    assert jnp.allclose(out, ref_bf16, atol=2e-3, rtol=2e-3), \
        float(jnp.max(jnp.abs(out - ref_bf16)))

    # Looser check against the pure-f32 module semantics (bf16 operand rounding).
    ref_f32 = _reference_forward_f32(x, wq, wk, wv, wp, bp)
    assert jnp.allclose(out, ref_f32, atol=5e-2, rtol=5e-2), \
        float(jnp.max(jnp.abs(out - ref_f32)))

    print("KERNEL_OK")
</pallas_src>

<mosaic_0001>
module attributes {stable_mosaic.version = 11 : i64} {
  func.func @_fused_mha_kernel(%arg0: i32, %arg1: memref<1x8x128xf32, #tpu.memory_space<vmem>>, %arg2: memref<128x384xf32, #tpu.memory_space<vmem>>, %arg3: memref<128x128xf32, #tpu.memory_space<vmem>>, %arg4: memref<1x128xf32, #tpu.memory_space<vmem>>, %arg5: memref<1x8x128xf32, #tpu.memory_space<vmem>>) attributes {dimension_semantics = [#tpu.dimension_semantics<parallel>], iteration_bounds = array<i64: 2>, scalar_prefetch = 0 : i64, scratch_operands = 0 : i64, tpu.core_type = #tpu.core_type<tc>, window_params = [{transform_indices = @transform_0, window_bounds = array<i64: 1, 8, 128>}, {pipeline_mode = #tpu.pipeline_mode<synchronous>, transform_indices = @transform_1, window_bounds = array<i64: 128, 384>}, {pipeline_mode = #tpu.pipeline_mode<synchronous>, transform_indices = @transform_2, window_bounds = array<i64: 128, 128>}, {pipeline_mode = #tpu.pipeline_mode<synchronous>, transform_indices = @transform_3, window_bounds = array<i64: 1, 128>}, {transform_indices = @transform_4, window_bounds = array<i64: 1, 8, 128>}]} {
    %c0 = arith.constant 0 : index
    %c0_0 = arith.constant 0 : index
    %c0_1 = arith.constant 0 : index
    %0 = vector.load %arg1[%c0, %c0_0, %c0_1] : memref<1x8x128xf32, #tpu.memory_space<vmem>>, vector<1x8x128xf32>
    %1 = vector.shape_cast %0 : vector<1x8x128xf32> to vector<8x128xf32>
    %2 = arith.truncf %1 : vector<8x128xf32> to vector<8x128xbf16>
    %c0_2 = arith.constant 0 : index
    %c0_3 = arith.constant 0 : index
    %3 = vector.load %arg2[%c0_2, %c0_3] : memref<128x384xf32, #tpu.memory_space<vmem>>, vector<128x384xf32>
    %4 = arith.truncf %3 : vector<128x384xf32> to vector<128x384xbf16>
    %cst = arith.constant dense<0.000000e+00> : vector<8x384xf32>
    %5 = tpu.matmul %2, %4, %cst {dimension_numbers = #tpu.dot_dimension_numbers<[1], [0], [0], [1], [0, 0, 1, 1], [], []>} : vector<8x128xbf16>, vector<128x384xbf16>, vector<8x384xf32> -> vector<8x384xf32>
    %6 = tpu.iota {dimensions = array<i32: 0>} : vector<8x8xi32>
    %7 = tpu.iota {dimensions = array<i32: 1>} : vector<8x8xi32>
    %8 = arith.cmpi sle, %7, %6 : vector<8x8xi32>
    %c0_4 = arith.constant 0 : index
    %c0_5 = arith.constant 0 : index
    %9 = vector.load %arg3[%c0_4, %c0_5] : memref<128x128xf32, #tpu.memory_space<vmem>>, vector<128x128xf32>
    %10 = arith.truncf %9 : vector<128x128xf32> to vector<128x128xbf16>
    %cst_6 = arith.constant 0.000000e+00 : f32
    %11 = vector.broadcast %cst_6 : f32 to vector<8x128xf32>
    %12 = vector.extract_strided_slice %5 {offsets = [0, 0], sizes = [8, 16], strides = [1, 1]} : vector<8x384xf32> to vector<8x16xf32>
    %13 = vector.extract_strided_slice %5 {offsets = [0, 128], sizes = [8, 16], strides = [1, 1]} : vector<8x384xf32> to vector<8x16xf32>
    %14 = vector.extract_strided_slice %5 {offsets = [0, 256], sizes = [8, 16], strides = [1, 1]} : vector<8x384xf32> to vector<8x16xf32>
    %15 = arith.truncf %12 : vector<8x16xf32> to vector<8x16xbf16>
    %16 = arith.truncf %13 : vector<8x16xf32> to vector<8x16xbf16>
    %17 = tpu.transpose %16, [1, 0] : vector<8x16xbf16> -> vector<16x8xbf16>
    %cst_7 = arith.constant dense<0.000000e+00> : vector<8x8xf32>
    %18 = tpu.matmul %15, %17, %cst_7 {dimension_numbers = #tpu.dot_dimension_numbers<[1], [0], [0], [1], [0, 0, 1, 1], [], []>} : vector<8x16xbf16>, vector<16x8xbf16>, vector<8x8xf32> -> vector<8x8xf32>
    %cst_8 = arith.constant 2.500000e-01 : f32
    %19 = vector.broadcast %cst_8 : f32 to vector<8x8xf32>
    %20 = arith.mulf %18, %19 : vector<8x8xf32>
    %cst_9 = arith.constant 0xFF800000 : f32
    %21 = vector.broadcast %cst_9 : f32 to vector<8x8xf32>
    %22 = arith.select %8, %20, %21 : vector<8x8xi1>, vector<8x8xf32>
    %cst_10 = arith.constant dense<0xFF800000> : vector<8xf32>
    %23 = vector.multi_reduction <maximumf>, %22, %cst_10 [1] : vector<8x8xf32> to vector<8xf32>
    %cst_11 = arith.constant 0xFF800000 : f32
    %24 = vector.broadcast %cst_11 : f32 to vector<8xf32>
    %25 = arith.maximumf %24, %23 : vector<8xf32>
    %26 = vector.shape_cast %25 : vector<8xf32> to vector<8x1xf32>
    %27 = vector.broadcast %26 : vector<8x1xf32> to vector<8x8xf32>
    %28 = arith.subf %22, %27 : vector<8x8xf32>
    %29 = math.exp %28 : vector<8x8xf32>
    %cst_12 = arith.constant dense<0.000000e+00> : vector<8xf32>
    %30 = vector.multi_reduction <add>, %29, %cst_12 [1] : vector<8x8xf32> to vector<8xf32>
    %31 = vector.shape_cast %30 : vector<8xf32> to vector<8x1xf32>
    %32 = vector.broadcast %31 : vector<8x1xf32> to vector<8x8xf32>
    %33 = arith.divf %29, %32 : vector<8x8xf32>
    %34 = arith.truncf %33 : vector<8x8xf32> to vector<8x8xbf16>
    %35 = arith.truncf %14 : vector<8x16xf32> to vector<8x16xbf16>
    %cst_13 = arith.constant dense<0.000000e+00> : vector<8x16xf32>
    %36 = tpu.matmul %34, %35, %cst_13 {dimension_numbers = #tpu.dot_dimension_numbers<[1], [0], [0], [1], [0, 0, 1, 1], [], []>} : vector<8x8xbf16>, vector<8x16xbf16>, vector<8x16xf32> -> vector<8x16xf32>
    %37 = arith.truncf %36 : vector<8x16xf32> to vector<8x16xbf16>
    %38 = vector.extract_strided_slice %10 {offsets = [0, 0], sizes = [16, 128], strides = [1, 1]} : vector<128x128xbf16> to vector<16x128xbf16>
    %cst_14 = arith.constant dense<0.000000e+00> : vector<8x128xf32>
    %39 = tpu.matmul %37, %38, %cst_14 {dimension_numbers = #tpu.dot_dimension_numbers<[1], [0], [0], [1], [0, 0, 1, 1], [], []>} : vector<8x16xbf16>, vector<16x128xbf16>, vector<8x128xf32> -> vector<8x128xf32>
    %40 = arith.addf %11, %39 : vector<8x128xf32>
    %41 = vector.extract_strided_slice %5 {offsets = [0, 16], sizes = [8, 16], strides = [1, 1]} : vector<8x384xf32> to vector<8x16xf32>
    %42 = vector.extract_strided_slice %5 {offsets = [0, 144], sizes = [8, 16], strides = [1, 1]} : vector<8x384xf32> to vector<8x16xf32>
    %43 = vector.extract_strided_slice %5 {offsets = [0, 272], sizes = [8, 16], strides = [1, 1]} : vector<8x384xf32> to vector<8x16xf32>
    %44 = arith.truncf %41 : vector<8x16xf32> to vector<8x16xbf16>
    %45 = arith.truncf %42 : vector<8x16xf32> to vector<8x16xbf16>
    %46 = tpu.transpose %45, [1, 0] : vector<8x16xbf16> -> vector<16x8xbf16>
    %cst_15 = arith.constant dense<0.000000e+00> : vector<8x8xf32>
    %47 = tpu.matmul %44, %46, %cst_15 {dimension_numbers = #tpu.dot_dimension_numbers<[1], [0], [0], [1], [0, 0, 1, 1], [], []>} : vector<8x16xbf16>, vector<16x8xbf16>, vector<8x8xf32> -> vector<8x8xf32>
    %cst_16 = arith.constant 2.500000e-01 : f32
    %48 = vector.broadcast %cst_16 : f32 to vector<8x8xf32>
    %49 = arith.mulf %47, %48 : vector<8x8xf32>
    %cst_17 = arith.constant 0xFF800000 : f32
    %50 = vector.broadcast %cst_17 : f32 to vector<8x8xf32>
    %51 = arith.select %8, %49, %50 : vector<8x8xi1>, vector<8x8xf32>
    %cst_18 = arith.constant dense<0xFF800000> : vector<8xf32>
    %52 = vector.multi_reduction <maximumf>, %51, %cst_18 [1] : vector<8x8xf32> to vector<8xf32>
    %cst_19 = arith.constant 0xFF800000 : f32
    %53 = vector.broadcast %cst_19 : f32 to vector<8xf32>
    %54 = arith.maximumf %53, %52 : vector<8xf32>
    %55 = vector.shape_cast %54 : vector<8xf32> to vector<8x1xf32>
    %56 = vector.broadcast %55 : vector<8x1xf32> to vector<8x8xf32>
    %57 = arith.subf %51, %56 : vector<8x8xf32>
    %58 = math.exp %57 : vector<8x8xf32>
    %cst_20 = arith.constant dense<0.000000e+00> : vector<8xf32>
    %59 = vector.multi_reduction <add>, %58, %cst_20 [1] : vector<8x8xf32> to vector<8xf32>
    %60 = vector.shape_cast %59 : vector<8xf32> to vector<8x1xf32>
    %61 = vector.broadcast %60 : vector<8x1xf32> to vector<8x8xf32>
    %62 = arith.divf %58, %61 : vector<8x8xf32>
    %63 = arith.truncf %62 : vector<8x8xf32> to vector<8x8xbf16>
    %64 = arith.truncf %43 : vector<8x16xf32> to vector<8x16xbf16>
    %cst_21 = arith.constant dense<0.000000e+00> : vector<8x16xf32>
    %65 = tpu.matmul %63, %64, %cst_21 {dimension_numbers = #tpu.dot_dimension_numbers<[1], [0], [0], [1], [0, 0, 1, 1], [], []>} : vector<8x8xbf16>, vector<8x16xbf16>, vector<8x16xf32> -> vector<8x16xf32>
    %66 = arith.truncf %65 : vector<8x16xf32> to vector<8x16xbf16>
    %67 = vector.extract_strided_slice %10 {offsets = [16, 0], sizes = [16, 128], strides = [1, 1]} : vector<128x128xbf16> to vector<16x128xbf16>
    %cst_22 = arith.constant dense<0.000000e+00> : vector<8x128xf32>
    %68 = tpu.matmul %66, %67, %cst_22 {dimension_numbers = #tpu.dot_dimension_numbers<[1], [0], [0], [1], [0, 0, 1, 1], [], []>} : vector<8x16xbf16>, vector<16x128xbf16>, vector<8x128xf32> -> vector<8x128xf32>
    %69 = arith.addf %40, %68 : vector<8x128xf32>
    %70 = vector.extract_strided_slice %5 {offsets = [0, 32], sizes = [8, 16], strides = [1, 1]} : vector<8x384xf32> to vector<8x16xf32>
    %71 = vector.extract_strided_slice %5 {offsets = [0, 160], sizes = [8, 16], strides = [1, 1]} : vector<8x384xf32> to vector<8x16xf32>
    %72 = vector.extract_strided_slice %5 {offsets = [0, 288], sizes = [8, 16], strides = [1, 1]} : vector<8x384xf32> to vector<8x16xf32>
    %73 = arith.truncf %70 : vector<8x16xf32> to vector<8x16xbf16>
    %74 = arith.truncf %71 : vector<8x16xf32> to vector<8x16xbf16>
    %75 = tpu.transpose %74, [1, 0] : vector<8x16xbf16> -> vector<16x8xbf16>
    %cst_23 = arith.constant dense<0.000000e+00> : vector<8x8xf32>
    %76 = tpu.matmul %73, %75, %cst_23 {dimension_numbers = #tpu.dot_dimension_numbers<[1], [0], [0], [1], [0, 0, 1, 1], [], []>} : vector<8x16xbf16>, vector<16x8xbf16>, vector<8x8xf32> -> vector<8x8xf32>
    %cst_24 = arith.constant 2.500000e-01 : f32
    %77 = vector.broadcast %cst_24 : f32 to vector<8x8xf32>
    %78 = arith.mulf %76, %77 : vector<8x8xf32>
    %cst_25 = arith.constant 0xFF800000 : f32
    %79 = vector.broadcast %cst_25 : f32 to vector<8x8xf32>
    %80 = arith.select %8, %78, %79 : vector<8x8xi1>, vector<8x8xf32>
    %cst_26 = arith.constant dense<0xFF800000> : vector<8xf32>
    %81 = vector.multi_reduction <maximumf>, %80, %cst_26 [1] : vector<8x8xf32> to vector<8xf32>
    %cst_27 = arith.constant 0xFF800000 : f32
    %82 = vector.broadcast %cst_27 : f32 to vector<8xf32>
    %83 = arith.maximumf %82, %81 : vector<8xf32>
    %84 = vector.shape_cast %83 : vector<8xf32> to vector<8x1xf32>
    %85 = vector.broadcast %84 : vector<8x1xf32> to vector<8x8xf32>
    %86 = arith.subf %80, %85 : vector<8x8xf32>
    %87 = math.exp %86 : vector<8x8xf32>
    %cst_28 = arith.constant dense<0.000000e+00> : vector<8xf32>
    %88 = vector.multi_reduction <add>, %87, %cst_28 [1] : vector<8x8xf32> to vector<8xf32>
    %89 = vector.shape_cast %88 : vector<8xf32> to vector<8x1xf32>
    %90 = vector.broadcast %89 : vector<8x1xf32> to vector<8x8xf32>
    %91 = arith.divf %87, %90 : vector<8x8xf32>
    %92 = arith.truncf %91 : vector<8x8xf32> to vector<8x8xbf16>
    %93 = arith.truncf %72 : vector<8x16xf32> to vector<8x16xbf16>
    %cst_29 = arith.constant dense<0.000000e+00> : vector<8x16xf32>
    %94 = tpu.matmul %92, %93, %cst_29 {dimension_numbers = #tpu.dot_dimension_numbers<[1], [0], [0], [1], [0, 0, 1, 1], [], []>} : vector<8x8xbf16>, vector<8x16xbf16>, vector<8x16xf32> -> vector<8x16xf32>
    %95 = arith.truncf %94 : vector<8x16xf32> to vector<8x16xbf16>
    %96 = vector.extract_strided_slice %10 {offsets = [32, 0], sizes = [16, 128], strides = [1, 1]} : vector<128x128xbf16> to vector<16x128xbf16>
    %cst_30 = arith.constant dense<0.000000e+00> : vector<8x128xf32>
    %97 = tpu.matmul %95, %96, %cst_30 {dimension_numbers = #tpu.dot_dimension_numbers<[1], [0], [0], [1], [0, 0, 1, 1], [], []>} : vector<8x16xbf16>, vector<16x128xbf16>, vector<8x128xf32> -> vector<8x128xf32>
    %98 = arith.addf %69, %97 : vector<8x128xf32>
    %99 = vector.extract_strided_slice %5 {offsets = [0, 48], sizes = [8, 16], strides = [1, 1]} : vector<8x384xf32> to vector<8x16xf32>
    %100 = vector.extract_strided_slice %5 {offsets = [0, 176], sizes = [8, 16], strides = [1, 1]} : vector<8x384xf32> to vector<8x16xf32>
    %101 = vector.extract_strided_slice %5 {offsets = [0, 304], sizes = [8, 16], strides = [1, 1]} : vector<8x384xf32> to vector<8x16xf32>
    %102 = arith.truncf %99 : vector<8x16xf32> to vector<8x16xbf16>
    %103 = arith.truncf %100 : vector<8x16xf32> to vector<8x16xbf16>
    %104 = tpu.transpose %103, [1, 0] : vector<8x16xbf16> -> vector<16x8xbf16>
    %cst_31 = arith.constant dense<0.000000e+00> : vector<8x8xf32>
    %105 = tpu.matmul %102, %104, %cst_31 {dimension_numbers = #tpu.dot_dimension_numbers<[1], [0], [0], [1], [0, 0, 1, 1], [], []>} : vector<8x16xbf16>, vector<16x8xbf16>, vector<8x8xf32> -> vector<8x8xf32>
    %cst_32 = arith.constant 2.500000e-01 : f32
    %106 = vector.broadcast %cst_32 : f32 to vector<8x8xf32>
    %107 = arith.mulf %105, %106 : vector<8x8xf32>
    %cst_33 = arith.constant 0xFF800000 : f32
    %108 = vector.broadcast %cst_33 : f32 to vector<8x8xf32>
    %109 = arith.select %8, %107, %108 : vector<8x8xi1>, vector<8x8xf32>
    %cst_34 = arith.constant dense<0xFF800000> : vector<8xf32>
    %110 = vector.multi_reduction <maximumf>, %109, %cst_34 [1] : vector<8x8xf32> to vector<8xf32>
    %cst_35 = arith.constant 0xFF800000 : f32
    %111 = vector.broadcast %cst_35 : f32 to vector<8xf32>
    %112 = arith.maximumf %111, %110 : vector<8xf32>
    %113 = vector.shape_cast %112 : vector<8xf32> to vector<8x1xf32>
    %114 = vector.broadcast %113 : vector<8x1xf32> to vector<8x8xf32>
    %115 = arith.subf %109, %114 : vector<8x8xf32>
    %116 = math.exp %115 : vector<8x8xf32>
    %cst_36 = arith.constant dense<0.000000e+00> : vector<8xf32>
    %117 = vector.multi_reduction <add>, %116, %cst_36 [1] : vector<8x8xf32> to vector<8xf32>
    %118 = vector.shape_cast %117 : vector<8xf32> to vector<8x1xf32>
    %119 = vector.broadcast %118 : vector<8x1xf32> to vector<8x8xf32>
    %120 = arith.divf %116, %119 : vector<8x8xf32>
    %121 = arith.truncf %120 : vector<8x8xf32> to vector<8x8xbf16>
    %122 = arith.truncf %101 : vector<8x16xf32> to vector<8x16xbf16>
    %cst_37 = arith.constant dense<0.000000e+00> : vector<8x16xf32>
    %123 = tpu.matmul %121, %122, %cst_37 {dimension_numbers = #tpu.dot_dimension_numbers<[1], [0], [0], [1], [0, 0, 1, 1], [], []>} : vector<8x8xbf16>, vector<8x16xbf16>, vector<8x16xf32> -> vector<8x16xf32>
    %124 = arith.truncf %123 : vector<8x16xf32> to vector<8x16xbf16>
    %125 = vector.extract_strided_slice %10 {offsets = [48, 0], sizes = [16, 128], strides = [1, 1]} : vector<128x128xbf16> to vector<16x128xbf16>
    %cst_38 = arith.constant dense<0.000000e+00> : vector<8x128xf32>
    %126 = tpu.matmul %124, %125, %cst_38 {dimension_numbers = #tpu.dot_dimension_numbers<[1], [0], [0], [1], [0, 0, 1, 1], [], []>} : vector<8x16xbf16>, vector<16x128xbf16>, vector<8x128xf32> -> vector<8x128xf32>
    %127 = arith.addf %98, %126 : vector<8x128xf32>
    %128 = vector.extract_strided_slice %5 {offsets = [0, 64], sizes = [8, 16], strides = [1, 1]} : vector<8x384xf32> to vector<8x16xf32>
    %129 = vector.extract_strided_slice %5 {offsets = [0, 192], sizes = [8, 16], strides = [1, 1]} : vector<8x384xf32> to vector<8x16xf32>
    %130 = vector.extract_strided_slice %5 {offsets = [0, 320], sizes = [8, 16], strides = [1, 1]} : vector<8x384xf32> to vector<8x16xf32>
    %131 = arith.truncf %128 : vector<8x16xf32> to vector<8x16xbf16>
    %132 = arith.truncf %129 : vector<8x16xf32> to vector<8x16xbf16>
    %133 = tpu.transpose %132, [1, 0] : vector<8x16xbf16> -> vector<16x8xbf16>
    %cst_39 = arith.constant dense<0.000000e+00> : vector<8x8xf32>
    %134 = tpu.matmul %131, %133, %cst_39 {dimension_numbers = #tpu.dot_dimension_numbers<[1], [0], [0], [1], [0, 0, 1, 1], [], []>} : vector<8x16xbf16>, vector<16x8xbf16>, vector<8x8xf32> -> vector<8x8xf32>
    %cst_40 = arith.constant 2.500000e-01 : f32
    %135 = vector.broadcast %cst_40 : f32 to vector<8x8xf32>
    %136 = arith.mulf %134, %135 : vector<8x8xf32>
    %cst_41 = arith.constant 0xFF800000 : f32
    %137 = vector.broadcast %cst_41 : f32 to vector<8x8xf32>
    %138 = arith.select %8, %136, %137 : vector<8x8xi1>, vector<8x8xf32>
    %cst_42 = arith.constant dense<0xFF800000> : vector<8xf32>
    %139 = vector.multi_reduction <maximumf>, %138, %cst_42 [1] : vector<8x8xf32> to vector<8xf32>
    %cst_43 = arith.constant 0xFF800000 : f32
    %140 = vector.broadcast %cst_43 : f32 to vector<8xf32>
    %141 = arith.maximumf %140, %139 : vector<8xf32>
    %142 = vector.shape_cast %141 : vector<8xf32> to vector<8x1xf32>
    %143 = vector.broadcast %142 : vector<8x1xf32> to vector<8x8xf32>
    %144 = arith.subf %138, %143 : vector<8x8xf32>
    %145 = math.exp %144 : vector<8x8xf32>
    %cst_44 = arith.constant dense<0.000000e+00> : vector<8xf32>
    %146 = vector.multi_reduction <add>, %145, %cst_44 [1] : vector<8x8xf32> to vector<8xf32>
    %147 = vector.shape_cast %146 : vector<8xf32> to vector<8x1xf32>
    %148 = vector.broadcast %147 : vector<8x1xf32> to vector<8x8xf32>
    %149 = arith.divf %145, %148 : vector<8x8xf32>
    %150 = arith.truncf %149 : vector<8x8xf32> to vector<8x8xbf16>
    %151 = arith.truncf %130 : vector<8x16xf32> to vector<8x16xbf16>
    %cst_45 = arith.constant dense<0.000000e+00> : vector<8x16xf32>
    %152 = tpu.matmul %150, %151, %cst_45 {dimension_numbers = #tpu.dot_dimension_numbers<[1], [0], [0], [1], [0, 0, 1, 1], [], []>} : vector<8x8xbf16>, vector<8x16xbf16>, vector<8x16xf32> -> vector<8x16xf32>
    %153 = arith.truncf %152 : vector<8x16xf32> to vector<8x16xbf16>
    %154 = vector.extract_strided_slice %10 {offsets = [64, 0], sizes = [16, 128], strides = [1, 1]} : vector<128x128xbf16> to vector<16x128xbf16>
    %cst_46 = arith.constant dense<0.000000e+00> : vector<8x128xf32>
    %155 = tpu.matmul %153, %154, %cst_46 {dimension_numbers = #tpu.dot_dimension_numbers<[1], [0], [0], [1], [0, 0, 1, 1], [], []>} : vector<8x16xbf16>, vector<16x128xbf16>, vector<8x128xf32> -> vector<8x128xf32>
    %156 = arith.addf %127, %155 : vector<8x128xf32>
    %157 = vector.extract_strided_slice %5 {offsets = [0, 80], sizes = [8, 16], strides = [1, 1]} : vector<8x384xf32> to vector<8x16xf32>
    %158 = vector.extract_strided_slice %5 {offsets = [0, 208], sizes = [8, 16], strides = [1, 1]} : vector<8x384xf32> to vector<8x16xf32>
    %159 = vector.extract_strided_slice %5 {offsets = [0, 336], sizes = [8, 16], strides = [1, 1]} : vector<8x384xf32> to vector<8x16xf32>
    %160 = arith.truncf %157 : vector<8x16xf32> to vector<8x16xbf16>
    %161 = arith.truncf %158 : vector<8x16xf32> to vector<8x16xbf16>
    %162 = tpu.transpose %161, [1, 0] : vector<8x16xbf16> -> vector<16x8xbf16>
    %cst_47 = arith.constant dense<0.000000e+00> : vector<8x8xf32>
    %163 = tpu.matmul %160, %162, %cst_47 {dimension_numbers = #tpu.dot_dimension_numbers<[1], [0], [0], [1], [0, 0, 1, 1], [], []>} : vector<8x16xbf16>, vector<16x8xbf16>, vector<8x8xf32> -> vector<8x8xf32>
    %cst_48 = arith.constant 2.500000e-01 : f32
    %164 = vector.broadcast %cst_48 : f32 to vector<8x8xf32>
    %165 = arith.mulf %163, %164 : vector<8x8xf32>
    %cst_49 = arith.constant 0xFF800000 : f32
    %166 = vector.broadcast %cst_49 : f32 to vector<8x8xf32>
    %167 = arith.select %8, %165, %166 : vector<8x8xi1>, vector<8x8xf32>
    %cst_50 = arith.constant dense<0xFF800000> : vector<8xf32>
    %168 = vector.multi_reduction <maximumf>, %167, %cst_50 [1] : vector<8x8xf32> to vector<8xf32>
    %cst_51 = arith.constant 0xFF800000 : f32
    %169 = vector.broadcast %cst_51 : f32 to vector<8xf32>
    %170 = arith.maximumf %169, %168 : vector<8xf32>
    %171 = vector.shape_cast %170 : vector<8xf32> to vector<8x1xf32>
    %172 = vector.broadcast %171 : vector<8x1xf32> to vector<8x8xf32>
    %173 = arith.subf %167, %172 : vector<8x8xf32>
    %174 = math.exp %173 : vector<8x8xf32>
    %cst_52 = arith.constant dense<0.000000e+00> : vector<8xf32>
    %175 = vector.multi_reduction <add>, %174, %cst_52 [1] : vector<8x8xf32> to vector<8xf32>
    %176 = vector.shape_cast %175 : vector<8xf32> to vector<8x1xf32>
    %177 = vector.broadcast %176 : vector<8x1xf32> to vector<8x8xf32>
    %178 = arith.divf %174, %177 : vector<8x8xf32>
    %179 = arith.truncf %178 : vector<8x8xf32> to vector<8x8xbf16>
    %180 = arith.truncf %159 : vector<8x16xf32> to vector<8x16xbf16>
    %cst_53 = arith.constant dense<0.000000e+00> : vector<8x16xf32>
    %181 = tpu.matmul %179, %180, %cst_53 {dimension_numbers = #tpu.dot_dimension_numbers<[1], [0], [0], [1], [0, 0, 1, 1], [], []>} : vector<8x8xbf16>, vector<8x16xbf16>, vector<8x16xf32> -> vector<8x16xf32>
    %182 = arith.truncf %181 : vector<8x16xf32> to vector<8x16xbf16>
    %183 = vector.extract_strided_slice %10 {offsets = [80, 0], sizes = [16, 128], strides = [1, 1]} : vector<128x128xbf16> to vector<16x128xbf16>
    %cst_54 = arith.constant dense<0.000000e+00> : vector<8x128xf32>
    %184 = tpu.matmul %182, %183, %cst_54 {dimension_numbers = #tpu.dot_dimension_numbers<[1], [0], [0], [1], [0, 0, 1, 1], [], []>} : vector<8x16xbf16>, vector<16x128xbf16>, vector<8x128xf32> -> vector<8x128xf32>
    %185 = arith.addf %156, %184 : vector<8x128xf32>
    %186 = vector.extract_strided_slice %5 {offsets = [0, 96], sizes = [8, 16], strides = [1, 1]} : vector<8x384xf32> to vector<8x16xf32>
    %187 = vector.extract_strided_slice %5 {offsets = [0, 224], sizes = [8, 16], strides = [1, 1]} : vector<8x384xf32> to vector<8x16xf32>
    %188 = vector.extract_strided_slice %5 {offsets = [0, 352], sizes = [8, 16], strides = [1, 1]} : vector<8x384xf32> to vector<8x16xf32>
    %189 = arith.truncf %186 : vector<8x16xf32> to vector<8x16xbf16>
    %190 = arith.truncf %187 : vector<8x16xf32> to vector<8x16xbf16>
    %191 = tpu.transpose %190, [1, 0] : vector<8x16xbf16> -> vector<16x8xbf16>
    %cst_55 = arith.constant dense<0.000000e+00> : vector<8x8xf32>
    %192 = tpu.matmul %189, %191, %cst_55 {dimension_numbers = #tpu.dot_dimension_numbers<[1], [0], [0], [1], [0, 0, 1, 1], [], []>} : vector<8x16xbf16>, vector<16x8xbf16>, vector<8x8xf32> -> vector<8x8xf32>
    %cst_56 = arith.constant 2.500000e-01 : f32
    %193 = vector.broadcast %cst_56 : f32 to vector<8x8xf32>
    %194 = arith.mulf %192, %193 : vector<8x8xf32>
    %cst_57 = arith.constant 0xFF800000 : f32
    %195 = vector.broadcast %cst_57 : f32 to vector<8x8xf32>
    %196 = arith.select %8, %194, %195 : vector<8x8xi1>, vector<8x8xf32>
    %cst_58 = arith.constant dense<0xFF800000> : vector<8xf32>
    %197 = vector.multi_reduction <maximumf>, %196, %cst_58 [1] : vector<8x8xf32> to vector<8xf32>
    %cst_59 = arith.constant 0xFF800000 : f32
    %198 = vector.broadcast %cst_59 : f32 to vector<8xf32>
    %199 = arith.maximumf %198, %197 : vector<8xf32>
    %200 = vector.shape_cast %199 : vector<8xf32> to vector<8x1xf32>
    %201 = vector.broadcast %200 : vector<8x1xf32> to vector<8x8xf32>
    %202 = arith.subf %196, %201 : vector<8x8xf32>
    %203 = math.exp %202 : vector<8x8xf32>
    %cst_60 = arith.constant dense<0.000000e+00> : vector<8xf32>
    %204 = vector.multi_reduction <add>, %203, %cst_60 [1] : vector<8x8xf32> to vector<8xf32>
    %205 = vector.shape_cast %204 : vector<8xf32> to vector<8x1xf32>
    %206 = vector.broadcast %205 : vector<8x1xf32> to vector<8x8xf32>
    %207 = arith.divf %203, %206 : vector<8x8xf32>
    %208 = arith.truncf %207 : vector<8x8xf32> to vector<8x8xbf16>
    %209 = arith.truncf %188 : vector<8x16xf32> to vector<8x16xbf16>
    %cst_61 = arith.constant dense<0.000000e+00> : vector<8x16xf32>
    %210 = tpu.matmul %208, %209, %cst_61 {dimension_numbers = #tpu.dot_dimension_numbers<[1], [0], [0], [1], [0, 0, 1, 1], [], []>} : vector<8x8xbf16>, vector<8x16xbf16>, vector<8x16xf32> -> vector<8x16xf32>
    %211 = arith.truncf %210 : vector<8x16xf32> to vector<8x16xbf16>
    %212 = vector.extract_strided_slice %10 {offsets = [96, 0], sizes = [16, 128], strides = [1, 1]} : vector<128x128xbf16> to vector<16x128xbf16>
    %cst_62 = arith.constant dense<0.000000e+00> : vector<8x128xf32>
    %213 = tpu.matmul %211, %212, %cst_62 {dimension_numbers = #tpu.dot_dimension_numbers<[1], [0], [0], [1], [0, 0, 1, 1], [], []>} : vector<8x16xbf16>, vector<16x128xbf16>, vector<8x128xf32> -> vector<8x128xf32>
    %214 = arith.addf %185, %213 : vector<8x128xf32>
    %215 = vector.extract_strided_slice %5 {offsets = [0, 112], sizes = [8, 16], strides = [1, 1]} : vector<8x384xf32> to vector<8x16xf32>
    %216 = vector.extract_strided_slice %5 {offsets = [0, 240], sizes = [8, 16], strides = [1, 1]} : vector<8x384xf32> to vector<8x16xf32>
    %217 = vector.extract_strided_slice %5 {offsets = [0, 368], sizes = [8, 16], strides = [1, 1]} : vector<8x384xf32> to vector<8x16xf32>
    %218 = arith.truncf %215 : vector<8x16xf32> to vector<8x16xbf16>
    %219 = arith.truncf %216 : vector<8x16xf32> to vector<8x16xbf16>
    %220 = tpu.transpose %219, [1, 0] : vector<8x16xbf16> -> vector<16x8xbf16>
    %cst_63 = arith.constant dense<0.000000e+00> : vector<8x8xf32>
    %221 = tpu.matmul %218, %220, %cst_63 {dimension_numbers = #tpu.dot_dimension_numbers<[1], [0], [0], [1], [0, 0, 1, 1], [], []>} : vector<8x16xbf16>, vector<16x8xbf16>, vector<8x8xf32> -> vector<8x8xf32>
    %cst_64 = arith.constant 2.500000e-01 : f32
    %222 = vector.broadcast %cst_64 : f32 to vector<8x8xf32>
    %223 = arith.mulf %221, %222 : vector<8x8xf32>
    %cst_65 = arith.constant 0xFF800000 : f32
    %224 = vector.broadcast %cst_65 : f32 to vector<8x8xf32>
    %225 = arith.select %8, %223, %224 : vector<8x8xi1>, vector<8x8xf32>
    %cst_66 = arith.constant dense<0xFF800000> : vector<8xf32>
    %226 = vector.multi_reduction <maximumf>, %225, %cst_66 [1] : vector<8x8xf32> to vector<8xf32>
    %cst_67 = arith.constant 0xFF800000 : f32
    %227 = vector.broadcast %cst_67 : f32 to vector<8xf32>
    %228 = arith.maximumf %227, %226 : vector<8xf32>
    %229 = vector.shape_cast %228 : vector<8xf32> to vector<8x1xf32>
    %230 = vector.broadcast %229 : vector<8x1xf32> to vector<8x8xf32>
    %231 = arith.subf %225, %230 : vector<8x8xf32>
    %232 = math.exp %231 : vector<8x8xf32>
    %cst_68 = arith.constant dense<0.000000e+00> : vector<8xf32>
    %233 = vector.multi_reduction <add>, %232, %cst_68 [1] : vector<8x8xf32> to vector<8xf32>
    %234 = vector.shape_cast %233 : vector<8xf32> to vector<8x1xf32>
    %235 = vector.broadcast %234 : vector<8x1xf32> to vector<8x8xf32>
    %236 = arith.divf %232, %235 : vector<8x8xf32>
    %237 = arith.truncf %236 : vector<8x8xf32> to vector<8x8xbf16>
    %238 = arith.truncf %217 : vector<8x16xf32> to vector<8x16xbf16>
    %cst_69 = arith.constant dense<0.000000e+00> : vector<8x16xf32>
    %239 = tpu.matmul %237, %238, %cst_69 {dimension_numbers = #tpu.dot_dimension_numbers<[1], [0], [0], [1], [0, 0, 1, 1], [], []>} : vector<8x8xbf16>, vector<8x16xbf16>, vector<8x16xf32> -> vector<8x16xf32>
    %240 = arith.truncf %239 : vector<8x16xf32> to vector<8x16xbf16>
    %241 = vector.extract_strided_slice %10 {offsets = [112, 0], sizes = [16, 128], strides = [1, 1]} : vector<128x128xbf16> to vector<16x128xbf16>
    %cst_70 = arith.constant dense<0.000000e+00> : vector<8x128xf32>
    %242 = tpu.matmul %240, %241, %cst_70 {dimension_numbers = #tpu.dot_dimension_numbers<[1], [0], [0], [1], [0, 0, 1, 1], [], []>} : vector<8x16xbf16>, vector<16x128xbf16>, vector<8x128xf32> -> vector<8x128xf32>
    %243 = arith.addf %214, %242 : vector<8x128xf32>
    %c0_71 = arith.constant 0 : index
    %c0_72 = arith.constant 0 : index
    %244 = vector.load %arg4[%c0_71, %c0_72] : memref<1x128xf32, #tpu.memory_space<vmem>>, vector<1x128xf32>
    %245 = vector.broadcast %244 : vector<1x128xf32> to vector<8x128xf32>
    %246 = arith.addf %243, %245 : vector<8x128xf32>
    %c0_73 = arith.constant 0 : index
    %c0_74 = arith.constant 0 : index
    %c0_75 = arith.constant 0 : index
    %247 = vector.load %arg5[%c0_73, %c0_74, %c0_75] : memref<1x8x128xf32, #tpu.memory_space<vmem>>, vector<1x8x128xf32>
    %248 = vector.shape_cast %247 : vector<1x8x128xf32> to vector<8x128xf32>
    %249 = vector.shape_cast %246 : vector<8x128xf32> to vector<1x8x128xf32>
    tpu.vector_store %arg5[%c0_73, %c0_74, %c0_75], %249 {strides = array<i32>} : memref<1x8x128xf32, #tpu.memory_space<vmem>>, vector<1x8x128xf32>,
    return
  }
  func.func @transform_0(%arg0: i32) -> (i32, i32, i32) {
    %c0_i32 = arith.constant 0 : i32
    %c0_i32_0 = arith.constant 0 : i32
    %c0_i32_1 = arith.constant 0 : i32
    return %arg0, %c0_i32, %c0_i32_0 : i32, i32, i32
  }
  func.func @transform_1(%arg0: i32) -> (i32, i32) {
    %c0_i32 = arith.constant 0 : i32
    %c0_i32_0 = arith.constant 0 : i32
    %c0_i32_1 = arith.constant 0 : i32
    return %c0_i32, %c0_i32_0 : i32, i32
  }
  func.func @transform_2(%arg0: i32) -> (i32, i32) {
    %c0_i32 = arith.constant 0 : i32
    %c0_i32_0 = arith.constant 0 : i32
    %c0_i32_1 = arith.constant 0 : i32
    return %c0_i32, %c0_i32_0 : i32, i32
  }
  func.func @transform_3(%arg0: i32) -> (i32, i32) {
    %c0_i32 = arith.constant 0 : i32
    %c0_i32_0 = arith.constant 0 : i32
    %c0_i32_1 = arith.constant 0 : i32
    return %c0_i32, %c0_i32_0 : i32, i32
  }
  func.func @transform_4(%arg0: i32) -> (i32, i32, i32) {
    %c0_i32 = arith.constant 0 : i32
    %c0_i32_0 = arith.constant 0 : i32
    %c0_i32_1 = arith.constant 0 : i32
    return %arg0, %c0_i32, %c0_i32_0 : i32, i32, i32
  }
}

</mosaic_0001>

<bundles_post_ra>
// kernel: multi_head_model_forward.1
= control target key start
LH: loop header
LB: loop body
LE: loop exit
PB: predicated region body
PF: predicated region fallthrough
CT: control target
= control target key end

     0   :  { %9 = vsyncpa [#allocation3], 0  ;;  %s1837_s0 = inlined_call_operand.vmem [shape: f32[2,8,128], index: 0, kind: input, shape index: {}]   ;;  %s1838_s1 = inlined_call_operand.vmem [shape: f32[128,384], index: 1, kind: input, shape index: {}]   ;;  %s1839_s2 = inlined_call_operand.vmem [shape: f32[128,128], index: 2, kind: input, shape index: {}]   ;;  %s1840_s3 = inlined_call_operand.vmem [shape: f32[1,128], index: 3, kind: input, shape index: {}]   ;;  %s1841_s4 = inlined_call_operand.hbm [shape: f32[2,8,128], index: 4, kind: output, shape index: {}]  }
   0x1   :  { %11 = vsyncpa [#allocation3 + $0x1], 0  ;;  %s1395_s15 = smov 0   ;;  %s1397_s16 = smov 0  }
   0x2   :  { %s1399_s17 = smov 0   ;;  %s1401_s18 = smov 0  }
   0x3 LB: > { %s1416_s19 = sadd.s32 4294967295, %s1361_s18   ;;  %s1186_s20 = sadd.s32 4294967294, %s1361_s18   ;;  %s1361_s18 = sphi %s1401_s18, %s1849_s18   ;;  %s1357_s17 = sphi %s1399_s17, %s1848_s17   ;;  %s1353_s16 = sphi %s1397_s16, %s1847_s16   ;;  %s1349_s15 = sphi %s1395_s15, %s1846_s15  }
   0x4   : > { %s1420_s21 = sadd.s32 1, %s1361_s18   ;;  %s113_s22 = sadd.s32 1, %s1357_s17 }
   0x5   : > { %s110_s23 = ssub.s32 %s1361_s18, %s1420_s21  ;;  %p123_p0 = scmp.ne.s32.totalorder %s1357_s17, %s1353_s16 }
   0x6   : > { %p111_p1 = scmp.eq.s32.totalorder %s110_s23, 0  ;;  %p124_p2 = scmp.eq.s32.totalorder %s1416_s19, 1 }
   0x7   : > { %p129_p3 = scmp.ne.s32.totalorder %s1353_s16, %s1349_s15  ;;  %p130_p4 = scmp.eq.s32.totalorder %s1186_s20, 1 }
   0x8   : > { %s1431_s24 = scalar_select %p111_p1, %s1357_s17, %s113_s22  }
   0x9   : > { %p1433_p5 = por %p124_p2, %p123_p0  ;;  %p1437_p6 = por %p130_p4, %p129_p3 }
   0xa   : > { %p1189_p7 = scmp.ge.s32.totalorder %s1361_s18, 1  ;;  %p164_p8 = scmp.lt.s32.totalorder %s1361_s18, 3 }
   0xc   : > { %p165_p9 = pnand %p1189_p7, %p164_p8 }
   0xd   : > { %p189_p10 = scmp.lt.s32.totalorder (!%p165_p9), %s1416_s19, 1  ;;  %s1364_s27 = smov (!%p165_p9), 112  }
   0xe   : > { %168 = sbr.rel (%p165_p9) target bundleno = 2504 (0x9c8), region = 36  ;;  %s1365_s28 = smov (!%p165_p9), 96  }
   0xf   : > { %s1366_s8 = smov (!%p165_p9), 48   ;;  %s1367_s9 = smov (!%p165_p9), 64  }
  0x10   : > { %s1368_s30 = smov (!%p165_p9), 32   ;;  %s186_s5 = sand.u32 (!%p165_p9), 1, %s1353_s16  }
  0x11   : > { %s1190_s7 = sshll.u32 (!%p165_p9), %s186_s5, 3  ;;  %s1319_s29 = scalar_lea.hbm (!%p165_p9), %s1841_s4, 16 }
  0x13   : > { %v238_v0 = vld [vmem:[%s1838_s1 + $0x150] sm:$0xff]  ;;  %v241_v1 = vld [vmem:[%s1838_s1 + $0x168] sm:$0xff]  ;;  %v239_v2 = vld [vmem:[%s1838_s1 + $0x158] sm:$0xff]  ;;  %s190_s10 = scalar_select %p189_p10, %s1416_s19, 1  ;;  %vm346_vm0 = vcmask 130048   ;;  %vm398_vm1 = vcmask 1043456  }
  0x14   : > { %v265_v3 = vpack.c.bf16 %v241_v1, %v238_v0  ;;  %v242_v4 = vld [vmem:[%s1838_s1 + $0x170] sm:$0xff]  ;;  %v232_v5 = vld [vmem:[%s1838_s1 + $0x120] sm:$0xff]  ;;  %v235_v6 = vld [vmem:[%s1838_s1 + $0x138] sm:$0xff]  ;;  %vm368_vm3 = vcmask 64512  }
  0x15   : > { %v266_v7 = vpack.c.bf16 %v242_v4, %v239_v2  ;;  %v233_v8 = vld [vmem:[%s1838_s1 + $0x128] sm:$0xff]  ;;  %v236_v9 = vld [vmem:[%s1838_s1 + $0x140] sm:$0xff]  ;;  %v262_v10 = vpack.c.bf16 %v235_v6, %v232_v5  ;;  %v226_v12 = vld [vmem:[%s1838_s1 + $0xf0] sm:$0xff]  ;;  %s1191_s6 = sshll.u32 %s190_s10, 3  ;;  %s188_s10 = scalar_lea.vmem [#allocation2], %s1190_s7 }
  0x16   : > { %268 = vmatpush.bf16.msra.mxu0 %v265_v3  ;;  %v263_v11 = vpack.c.bf16 %v236_v9, %v233_v8  ;;  %v229_v13 = vld [vmem:[%s1838_s1 + $0x108] sm:$0xff]  ;;  %v227_v14 = vld [vmem:[%s1838_s1 + $0xf8] sm:$0xff]  ;;  %v230_v15 = vld [vmem:[%s1838_s1 + $0x110] sm:$0xff]  ;;  %s192_s23 = scalar_lea.vmem %s1837_s0, %s1191_s6  ;;  %s1217_s6 = sshll.u32 %s1416_s19, 3 }
  0x17   : > { %281 = vmatpush.bf16.msra.mxu1 %v266_v7  ;;  %v259_v16 = vpack.c.bf16 %v229_v13, %v226_v12  ;;  %v260_v17 = vpack.c.bf16 %v230_v15, %v227_v14  ;;  %v220_v18 = vld [vmem:[%s1838_s1 + $0xc0] sm:$0xff]  ;;  %v223_v19 = vld [vmem:[%s1838_s1 + $0xd8] sm:$0xff]  ;;  %v221_v20 = vld [vmem:[%s1838_s1 + $0xc8] sm:$0xff]  ;;  %s1122_s12 = scalar_lea.hbm %s1841_s4, %s1217_s6  ;;  %s1112_s19 = scalar_lea.sflag [#allocation3], %s186_s5 }
  0x18   : > { %v224_v21 = vld [vmem:[%s1838_s1 + $0xe0] sm:$0xff]  ;;  %v256_v22 = vpack.c.bf16 %v223_v19, %v220_v18  ;;  %v243_v24 = vld [vmem:[%s1838_s1 + $0x178] sm:$0xff]  ;;  %v234_v25 = vld [vmem:[%s1838_s1 + $0x130] sm:$0xff]  ;;  %s1126_s20 = sshll.u32 %s1122_s12, 4  ;;  %s1127_s20 = int_to_ptr.hbm [resolvable:$true] %s1126_s20 }
  0x19   : > { %v240_v23 = vld [vmem:[%s1838_s1 + $0x160] sm:$0xff]  ;;  %v257_v26 = vpack.c.bf16 %v224_v21, %v221_v20  ;;  %v214_v27 = vld [vmem:[%s1838_s1 + $0x90] sm:$0xff]  ;;  %v217_v28 = vld [vmem:[%s1838_s1 + $0xa8] sm:$0xff]  ;;  %s1313_s22 = sshra.s32 %s1127_s20, 4  ;;  %s1314_s22 = int_to_ptr.hbm [resolvable:$true] %s1313_s22 }
  0x1a   : > { %269 = vmatpush.bf16.msra.mxu0 %v262_v10  ;;  %v267_v29 = vpack.c.bf16 %v243_v24, %v240_v23  ;;  %v237_v30 = vld [vmem:[%s1838_s1 + $0x148] sm:$0xff]  ;;  %v215_v31 = vld [vmem:[%s1838_s1 + $0x98] sm:$0xff]  ;;  %v218_v32 = vld [vmem:[%s1838_s1 + $0xb0] sm:$0xff]  ;;  %v253_v34 = vpack.c.bf16 %v217_v28, %v214_v27  ;;  %p1320_p0 = scmp.lt.s32.totalorder %s1314_s22, %s1841_s4 }
  0x1b   : > { %282 = vmatpush.bf16.msra.mxu1 %v263_v11  ;;  %v264_v33 = vpack.c.bf16 %v237_v30, %v234_v25  ;;  %v228_v35 = vld [vmem:[%s1838_s1 + $0x100] sm:$0xff]  ;;  %v231_v36 = vld [vmem:[%s1838_s1 + $0x118] sm:$0xff]  ;;  %v254_v37 = vpack.c.bf16 %v218_v32, %v215_v31  ;;  %v209_v40 = vld [vmem:[%s1838_s1 + $0x68] sm:$0xff]  ;;  %v307_v32 = vlaneseq }
  0x1c   : > { %294 = vmatpush.bf16.msra.mxu2 %v267_v29  ;;  %v208_v38 = vld [vmem:[%s1838_s1 + $0x60] sm:$0xff]  ;;  %v211_v39 = vld [vmem:[%s1838_s1 + $0x78] sm:$0xff]  ;;  %v261_v42 = vpack.c.bf16 %v231_v36, %v228_v35  ;;  %v222_v44 = vld [vmem:[%s1838_s1 + $0xd0] sm:$0xff] }
  0x1d   : > { %v212_v41 = vld [vmem:[%s1838_s1 + $0x80] sm:$0xff]  ;;  %v250_v43 = vpack.c.bf16 %v211_v39, %v208_v38  ;;  %v225_v45 = vld [vmem:[%s1838_s1 + $0xe8] sm:$0xff]  ;;  %v202_v47 = vld [vmem:[%s1838_s1 + $0x30] sm:$0xff] }
  0x1e   : > { %270 = vmatpush.bf16.msra.mxu0 %v259_v16  ;;  %v251_v46 = vpack.c.bf16 %v212_v41, %v209_v40  ;;  %v205_v48 = vld [vmem:[%s1838_s1 + $0x48] sm:$0xff]  ;;  %v203_v49 = vld [vmem:[%s1838_s1 + $0x38] sm:$0xff]  ;;  %v206_v50 = vld [vmem:[%s1838_s1 + $0x50] sm:$0xff]  ;;  %v258_v51 = vpack.c.bf16 %v225_v45, %v222_v44 }
  0x1f   : > { %283 = vmatpush.bf16.msra.mxu1 %v260_v17  ;;  %v247_v52 = vpack.c.bf16 %v205_v48, %v202_v47  ;;  %v216_v53 = vld [vmem:[%s1838_s1 + $0xa0] sm:$0xff]  ;;  %v219_v54 = vld [vmem:[%s1838_s1 + $0xb8] sm:$0xff]  ;;  %v248_v55 = vpack.c.bf16 %v206_v50, %v203_v49  ;;  %v197_v58 = vld [vmem:[%s1838_s1 + $0x8] sm:$0xff] }
  0x20   : > { %295 = vmatpush.bf16.msra.mxu2 %v264_v33  ;;  %v196_v56 = vld [vmem:[%s1838_s1] sm:$0xff]  ;;  %v199_v57 = vld [vmem:[%s1838_s1 + $0x18] sm:$0xff]  ;;  %v255_v60 = vpack.c.bf16 %v219_v54, %v216_v53  ;;  %v210_v63 = vld [vmem:[%s1838_s1 + $0x70] sm:$0xff]  ;;  %v308_v33 = vshrl.u32 %v307_v32, 7 }
  0x21   : > { %v200_v59 = vld [vmem:[%s1838_s1 + $0x20] sm:$0xff]  ;;  %v244_v61 = vpack.c.bf16 %v199_v57, %v196_v56  ;;  %v213_v0 = vld [vmem:[%s1838_s1 + $0x88] sm:$0xff]  ;;  %v207_v5 = vld [vmem:[%s1838_s1 + $0x58] sm:$0xff] }
  0x22   : > { %271 = vmatpush.bf16.msra.mxu0 %v256_v22  ;;  %v194_v62 = vld [vmem:[%s192_s23] sm:$0xff]  ;;  %v245_v1 = vpack.c.bf16 %v200_v59, %v197_v58  ;;  %v252_v3 = vpack.c.bf16 %v213_v0, %v210_v63  ;;  %v198_v7 = vld [vmem:[%s1838_s1 + $0x10] sm:$0xff]  ;;  %v201_v8 = vld [vmem:[%s1838_s1 + $0x28] sm:$0xff]  ;;  %s1363_s23 = smov 80  }
  0x23   : > { %284 = vmatpush.bf16.msra.mxu1 %v257_v26  ;;  %v195_v2 = vpack.c.bf16 %v194_v62, %v194_v62  ;;  %v204_v4 = vld [vmem:[%s1838_s1 + $0x40] sm:$0xff]  ;;  %v246_v9 = vpack.c.bf16 %v201_v8, %v198_v7  ;;  %v313_v18 = vld [vmem:[%s1839_s2 + $0x8] sm:$0xff] }
  0x24   : > { %296 = vmatpush.bf16.msra.mxu2 %v261_v42  ;;  %v249_v6 = vpack.c.bf16 %v207_v5, %v204_v4  ;;  %v312_v17 = vld [vmem:[%s1839_s2] sm:$0xff]  ;;  %v329_v20 = vpack.c.bf16 %v313_v18, %v313_v18 }
  0x25   : > { %v328_v19 = vpack.c.bf16 %v312_v17, %v312_v17 }
  0x26   : > { %272 = vmatpush.bf16.msra.mxu0 %v253_v34  ;;  %v516_v22 = vunpack.c.l.b16 %v329_v20  ;;  %v310_v34 = vand.u32 127, %v307_v32 }
  0x27   : > { %285 = vmatpush.bf16.msra.mxu1 %v254_v37  ;;  %v515_v21 = vunpack.c.l.b16 %v328_v19 }
  0x28   : > { %297 = vmatpush.bf16.msra.mxu2 %v258_v51  ;;  %vm1622_vm2 = vcmp.le.s32.totalorder %v310_v34, %v308_v33 }
  0x29   : > { %v517_v23 = vpack.c.b16 %v516_v22, %v515_v21 }
  0x2a   : > { %273 = vmatpush.bf16.msra.mxu0 %v250_v43 }
  0x2b   : > { %286 = vmatpush.bf16.msra.mxu1 %v251_v46 }
  0x2c   : > { %298 = vmatpush.bf16.msra.mxu2 %v255_v60 }
  0x2e   : > { %274 = vmatpush.bf16.msra.mxu0 %v247_v52 }
  0x2f   : > { %287 = vmatpush.bf16.msra.mxu1 %v248_v55 }
  0x30   : > { %299 = vmatpush.bf16.msra.mxu2 %v252_v3 }
  0x32   : > { %275 = vmatpush.bf16.msra.mxu0 %v244_v61 }
  0x33   : > { %288 = vmatpush.bf16.msra.mxu1 %v245_v1 }
  0x34   : > { %300 = vmatpush.bf16.msra.mxu2 %v249_v6 }
  0x35   : > { %276 = vmatmul.bf16.vlgmr.msra.gmra.mxu0 %v195_v2 }
  0x36   : > { %289 = vmatmul.bf16.vlgmr.msra.gmra.mxu1 %v195_v2 }
  0x38   : > { %301 = vmatpush.bf16.msra.mxu2 %v246_v9 }
  0x3b   : > { %302 = vmatmul.bf16.vlgmr.msra.gmra.mxu2 %v195_v2 }
  0x3c   : > { %529 = vmatpush.bf16.msrb.mxu2 %v517_v23 }
  0xb2   : > { %v277_v10 = vpop.f32.mrf.mxu0 }
  0xb3   : > { %v290_v11 = vpop.f32.mrf.mxu1  ;;  %v1600_v14 = vpack.c.bf16 %v277_v10, %v277_v10 }
  0xb4   : > { %v1592_v12 = vpack.c.bf16 %v290_v11, %v290_v11 }
  0xb6   : > { %632 = vrot.lane.b32.xlu2 %v1592_v12, %s1363_s23  ;;  %420 = vrot.lane.b32.xlu1 %v1592_v12, %s1364_s27  ;;  %v351_v13 = vsel %vm346_vm0, %v1592_v12, 0 }
  0xb7   : > { %360 = vmatpush.bf16.xpose.msra.mxu3 %v351_v13 }
  0xba   : > { %v279_v15 = vpop.f32.mrf.mxu0 }
  0xbb   : > { %v292_v16 = vpop.f32.mrf.mxu1 }
  0xbe   : > { %537 = vrot.lane.b32.xlu2 %v1592_v12, %s1365_s28  ;;  %417 = vrot.lane.b32.xlu1 %v1600_v14, %s1364_s27  ;;  %v303_v24 = vpop.f32.mrf.mxu2 }
  0xbf   : > { %1192 = vmatmul.msk.bf16.vlgmr.msra.gmra.mxu3 %vm346_vm0, %v1600_v14  ;;  %v1616_v26 = vpack.c.bf16 %v303_v24, %v303_v24 }
  0xc1   : > { %v400_v27 = vsel %vm398_vm1, %v1616_v26, 0 }
  0xc2   : > { %409 = vmatpush.bf16.msrb.mxu3 %v400_v27 }
  0xc6   : > { %535 = vrot.lane.b32.xlu1 %v1600_v14, %s1365_s28  ;;  %v305_v25 = vpop.f32.mrf.mxu2 }
 0x110   : > { %v633_v28 = vpop.permute.xlu2 %632 }
 0x111   : > { %v638_v29 = vsel %vm346_vm0, %v633_v28, 0 }
 0x112   : > { %647 = vmatpush.bf16.xpose.msra.mxu2 %v638_v29 }
 0x118   : > { %v538_v58 = vpop.permute.xlu2 %537 }
 0x119   : > { %v543_v60 = vsel %vm346_vm0, %v538_v58, 0 }
 0x128   : > { %v421_v30 = vpop.permute.xlu1 %420 }
 0x129   : > { %v426_v31 = vsel %vm346_vm0, %v421_v30, 0 }
 0x12a   : > { %435 = vmatpush.bf16.xpose.msra.mxu3 %v426_v31 }
 0x130   : > { %v418_v61 = vpop.permute.xlu1 %417 }
 0x138   : > { %v536_v62 = vpop.permute.xlu1 %535 }
 0x142   : > { %v362_v35 = vpop.f32.mrf.mxu3 }
 0x143   : > { %v366_v37 = vmul.f32 0.25, %v362_v35 }
 0x145   : > { %v367_v38 = vsel %vm1622_vm2, %v366_v37, -inf }
 0x146   : > { %v369_v39 = vsel %vm368_vm3, %v367_v38, -inf }
 0x147   : > { %370 = vmax.xlane.f32.xlu0 %v369_v39 }
 0x14a   : > { %v364_v40 = vpop.f32.mrf.mxu3 }
 0x1ba   : > { %v371_v41 = vpop.xlane.xlu0 %370 }
 0x1bb   : > { %v372_v42 = vsub.f32 %v367_v38, %v371_v41 }
 0x1bd   : > { %v373_v43 = vmul.f32 1.442695, %v372_v42 }
 0x1bf   : > { %1267 = vpow2.f32 %v373_v43 }
 0x1c5   : > { %v1268_v44 = vpop.eup %1267 }
 0x1c6   : > { %v375_v45 = vsel %vm368_vm3, %v1268_v44, 0.0 }
 0x1c7   : > { %376 = vadd.xlane.f32.xlu0 %v375_v45 }
 0x1db   : > { %630 = vrot.lane.b32.xlu0 %v1600_v14, %s1363_s23 }
 0x23a   : > { %v377_v46 = vpop.xlane.xlu0 %376 }
 0x23b   : > { %1269 = vrcp.f32 %v377_v46  ;;  %v389_v50 = vand.u32 2147483648, %v377_v46  ;;  %v387_v52 = vand.u32 2147483647, %v377_v46  ;;  %vm383_vm5 = vweird.f32 %v377_v46 }
 0x23d   : > { %v390_v54 = vor.u32 1.1754944e-38, %v389_v50  ;;  %vm388_vm7 = vcmp.eq.f32.partialorder %v387_v52, 8.507059e+37  ;;  %v314_v50 = vld [vmem:[%s1839_s2 + $0x10] sm:$0xff] }
 0x241   : > { %v1270_v47 = vpop.eup %1269 }
 0x242   : > { %v379_v48 = vmul.f32 %v1270_v47, %v377_v46  ;;  %vm384_vm4 = vweird.f32 %v1270_v47 }
 0x243   : > { %vm385_vm6 = vmor %vm383_vm5, %vm384_vm4 }
 0x244   : > { %v380_v49 = vsub.f32 1.0, %v379_v48 }
 0x246   : > { %v381_v51 = vmul.f32 %v1270_v47, %v380_v49 }
 0x248   : > { %v382_v53 = vadd.f32 %v1270_v47, %v381_v51  ;;  %v315_v51 = vld [vmem:[%s1839_s2 + $0x18] sm:$0xff] }
 0x24a   : > { %v386_v55 = vsel %vm385_vm6, %v1270_v47, %v382_v53  ;;  %v318_v53 = vld [vmem:[%s1839_s2 + $0x30] sm:$0xff] }
 0x24b   : > { %v391_v56 = vsel %vm388_vm7, %v390_v54, %v386_v55  ;;  %v319_v54 = vld [vmem:[%s1839_s2 + $0x38] sm:$0xff]  ;;  %v330_v55 = vpack.c.bf16 %v314_v50, %v314_v50 }
 0x24c   : > { %v392_v57 = vmul.f32 %v1268_v44, %v391_v56  ;;  %v331_v56 = vpack.c.bf16 %v315_v51, %v315_v51 }
 0x24d   : > { %v631_v4 = vpop.permute.xlu0 %630 }
 0x24e   : > { %v393_v59 = vpack.c.bf16 %v392_v57, %v392_v57 }
 0x250   : > { %1193 = vmatmul.msk.bf16.vlgmr.msrb.gmra.mxu3 %vm368_vm3, %v393_v59 }
 0x251   : > { %552 = vmatpush.bf16.xpose.msrb.mxu3 %v543_v60 }
 0x260   : > { %1194 = vmatmul.msk.bf16.vlgmr.msra.gmra.mxu3 %vm346_vm0, %v418_v61  ;;  %v334_v61 = vpack.c.bf16 %v318_v53, %v318_v53 }
 0x270   : > { %1198 = vmatmul.msk.bf16.vlgmr.msrb.gmra.mxu3 %vm346_vm0, %v536_v62  ;;  %v335_v62 = vpack.c.bf16 %v319_v54, %v319_v54 }
 0x2d3   : > { %v411_v63 = vpop.f32.mrf.mxu3 }
 0x2d4   : > { %v415_v0 = vpack.c.bf16 %v411_v63, %v411_v63  ;;  %v493_v63 = vunpack.c.l.b16 %v330_v55 }
 0x2d6   : > { %1197 = vmatmul.msk.bf16.vlgmr.msrb.gmra.mxu2 %vm346_vm0, %v415_v0  ;;  %v494_v0 = vunpack.c.l.b16 %v331_v56 }
 0x2db   : > { %v413_v1 = vpop.f32.mrf.mxu3 }
 0x2e3   : > { %v437_v2 = vpop.f32.mrf.mxu3 }
 0x2e4   : > { %v441_v3 = vmul.f32 0.25, %v437_v2  ;;  %v495_v2 = vpack.c.b16 %v494_v0, %v493_v63 }
 0x2e6   : > { %1201 = vmatmul.msk.bf16.vlgmr.msra.gmra.mxu2 %vm346_vm0, %v631_v4  ;;  %v442_v5 = vsel %vm1622_vm2, %v441_v3, -inf  ;;  %v704_v4 = vunpack.c.l.b16 %v334_v61  ;;  %507 = vmatpush.bf16.msrb.mxu1 %v495_v2 }
 0x2e7   : > { %v443_v6 = vsel %vm368_vm3, %v442_v5, -inf }
 0x2e8   : > { %444 = vmax.xlane.f32.xlu2 %v443_v6 }
 0x2eb   : > { %v439_v7 = vpop.f32.mrf.mxu3 }
 0x2f3   : > { %v554_v8 = vpop.f32.mrf.mxu3 }
 0x2f4   : > { %v558_v9 = vmul.f32 0.25, %v554_v8 }
 0x2f6   : > { %v559_v10 = vsel %vm1622_vm2, %v558_v9, -inf }
 0x2f7   : > { %v560_v11 = vsel %vm368_vm3, %v559_v10, -inf }
 0x2f8   : > { %561 = vmax.xlane.f32.xlu0 %v560_v11 }
 0x2fb   : > { %v556_v13 = vpop.f32.mrf.mxu3 }
 0x30c   : > { %585 = vrot.lane.b32.xlu0 %v1616_v26, %s1365_s28 }
 0x314   : > { %822 = vrot.lane.b32.xlu0 %v1592_v12, %s1366_s8 }
 0x359   : > { %v1648_v15 = vpop.f32.mrf.mxu2 }
 0x35b   : > { %v445_v16 = vpop.xlane.xlu2 %444 }
 0x35c   : > { %v446_v17 = vsub.f32 %v442_v5, %v445_v16  ;;  %v705_v5 = vunpack.c.l.b16 %v335_v62 }
 0x35e   : > { %v447_v18 = vmul.f32 1.442695, %v446_v17 }
 0x360   : > { %1271 = vpow2.f32 %v447_v18  ;;  %v706_v18 = vpack.c.b16 %v705_v5, %v704_v4 }
 0x361   : > { %v533_v19 = vpop.f32.mrf.mxu2 }
 0x366   : > { %v1650_v20 = vpop.eup %1271 }
 0x367   : > { %v449_v21 = vsel %vm368_vm3, %v1650_v20, 0.0 }
 0x368   : > { %450 = vadd.xlane.f32.xlu2 %v449_v21 }
 0x369   : > { %v649_v22 = vpop.f32.mrf.mxu2 }
 0x36a   : > { %v653_v23 = vmul.f32 0.25, %v649_v22 }
 0x36b   : > { %v562_v24 = vpop.xlane.xlu0 %561 }
 0x36c   : > { %v563_v25 = vsub.f32 %v559_v10, %v562_v24  ;;  %v654_v27 = vsel %vm1622_vm2, %v653_v23, -inf }
 0x36d   : > { %v655_v28 = vsel %vm368_vm3, %v654_v27, -inf }
 0x36e   : > { %v564_v29 = vmul.f32 1.442695, %v563_v25  ;;  %656 = vmax.xlane.f32.xlu1 %v655_v28 }
 0x370   : > { %1273 = vpow2.f32 %v564_v29 }
 0x371   : > { %v651_v30 = vpop.f32.mrf.mxu2 }
 0x376   : > { %v1657_v31 = vpop.eup %1273 }
 0x377   : > { %v566_v32 = vsel %vm368_vm3, %v1657_v31, 0.0 }
 0x378   : > { %567 = vadd.xlane.f32.xlu1 %v566_v32 }
 0x37e   : > { %v586_v7 = vpop.permute.xlu0 %585 }
 0x37f   : > { %v591_v16 = vsel %vm398_vm1, %v586_v7, 0 }
 0x391   : > { %680 = vrot.lane.b32.xlu1 %v1616_v26, %s1363_s23  ;;  %s1315_s23 = scalar_lea.hbm %s1314_s22, 8 }
 0x392   : > { %p1316_p11 = scmp.ne.s32.totalorder %s1314_s22, %s1315_s23  ;;  %p1321_p1 = scmp.lt.s32.totalorder %s1319_s29, %s1315_s23 }
 0x394   : > { %p1317_p12 = pnand %p1316_p11, %p1433_p5  ;;  %p1322_p2 = por %p1321_p1, %p1320_p0 }
 0x396   : > { %p1318_p13 = pneg %p1317_p12 }
 0x398   : > { %p1323_p3 = pnand %p1322_p2, %p1318_p13 }
 0x399   : > { %725 = vrot.lane.b32.xlu1 %v1600_v14, %s1367_s9 }
 0x3db   : > { %v451_v42 = vpop.xlane.xlu2 %450 }
 0x3dc   : > { %v463_v48 = vand.u32 2147483648, %v451_v42  ;;  %vm457_vm9 = vweird.f32 %v451_v42  ;;  %v461_v52 = vand.u32 2147483647, %v451_v42 }
 0x3de   : > { %v464_v58 = vor.u32 1.1754944e-38, %v463_v48  ;;  %vm462_vm11 = vcmp.eq.f32.partialorder %v461_v52, 8.507059e+37 }
 0x3e1   : > { %v657_v33 = vpop.xlane.xlu1 %656 }
 0x3e2   : > { %v658_v34 = vsub.f32 %v654_v27, %v657_v33 }
 0x3e4   : > { %v659_v35 = vmul.f32 1.442695, %v658_v34 }
 0x3e6   : > { %1275 = vpow2.f32 %v659_v35 }
 0x3e7   : > { %1277 = vrcp.f32 %v451_v42 }
 0x3eb   : > { %v1669_v39 = vpop.xlane.xlu1 %567 }
 0x3ec   : > { %v1665_v37 = vpop.eup %1275  ;;  %1279 = vrcp.f32 %v1669_v39  ;;  %vm574_vm15 = vweird.f32 %v1669_v39  ;;  %v578_v27 = vand.u32 2147483647, %v1669_v39 }
 0x3ed   : > { %v661_v38 = vsel %vm368_vm3, %v1665_v37, 0.0  ;;  %v1278_v43 = vpop.eup %1277 }
 0x3ee   : > { %662 = vadd.xlane.f32.xlu2 %v661_v38  ;;  %v453_v44 = vmul.f32 %v1278_v43, %v451_v42  ;;  %vm458_vm8 = vweird.f32 %v1278_v43  ;;  %vm579_vm7 = vcmp.eq.f32.partialorder %v578_v27, 8.507059e+37 }
 0x3ef   : > { %vm459_vm10 = vmor %vm457_vm9, %vm458_vm8 }
 0x3f0   : > { %v454_v45 = vsub.f32 1.0, %v453_v44 }
 0x3f2   : > { %v455_v46 = vmul.f32 %v1278_v43, %v454_v45  ;;  %v1679_v49 = vpop.eup %1279 }
 0x3f3   : > { %v570_v59 = vmul.f32 %v1679_v49, %v1669_v39  ;;  %vm575_vm13 = vweird.f32 %v1679_v49 }
 0x3f4   : > { %v456_v47 = vadd.f32 %v1278_v43, %v455_v46  ;;  %vm576_vm5 = vmor %vm574_vm15, %vm575_vm13 }
 0x3f5   : > { %v571_v3 = vsub.f32 1.0, %v570_v59 }
 0x3f6   : > { %v460_v60 = vsel %vm459_vm10, %v1278_v43, %v456_v47  ;;  %v316_v43 = vld [vmem:[%s1839_s2 + $0x20] sm:$0xff] }
 0x3f7   : > { %v465_v1 = vsel %vm462_vm11, %v464_v58, %v460_v60  ;;  %v572_v11 = vmul.f32 %v1679_v49, %v571_v3  ;;  %v332_v44 = vpack.c.bf16 %v316_v43, %v316_v43  ;;  %v322_v43 = vld [vmem:[%s1839_s2 + $0x50] sm:$0xff] }
 0x3f8   : > { %v466_v8 = vmul.f32 %v1650_v20, %v465_v1  ;;  %v580_v20 = vand.u32 2147483648, %v1669_v39 }
 0x3f9   : > { %v573_v24 = vadd.f32 %v1679_v49, %v572_v11  ;;  %v609_v46 = vunpack.c.l.b16 %v332_v44  ;;  %v338_v44 = vpack.c.bf16 %v322_v43, %v322_v43 }
 0x3fa   : > { %v467_v21 = vpack.c.bf16 %v466_v8, %v466_v8  ;;  %v581_v33 = vor.u32 1.1754944e-38, %v580_v20 }
 0x3fb   : > { %v577_v30 = vsel %vm576_vm5, %v1679_v49, %v573_v24 }
 0x3fc   : > { %v582_v35 = vsel %vm579_vm7, %v581_v33, %v577_v30 }
 0x403   : > { %v681_v40 = vpop.permute.xlu1 %680 }
 0x404   : > { %v686_v41 = vsel %vm398_vm1, %v681_v40, 0  ;;  %v583_v40 = vmul.f32 %v1657_v31, %v582_v35 }
 0x405   : > { %695 = vmatpush.bf16.msra.mxu3 %v686_v41  ;;  %v823_v41 = vpop.permute.xlu0 %822 }
 0x406   : > { %469 = vrot.lane.b32.xlu2 %v1616_v26, %s1364_s27  ;;  %v584_v39 = vpack.c.bf16 %v583_v40, %v583_v40  ;;  %v828_v42 = vsel %vm346_vm0, %v823_v41, 0 }
 0x40b   : > { %v726_v60 = vpop.permute.xlu1 %725 }
 0x40e   : > { %727 = vrot.lane.b32.xlu2 %v1592_v12, %s1367_s9 }
 0x416   : > { %820 = vrot.lane.b32.xlu2 %v1600_v14, %s1366_s8 }
 0x461   : > { %v663_v57 = vpop.xlane.xlu2 %662 }
 0x462   : > { %1281 = vrcp.f32 %v663_v57  ;;  %v675_v19 = vand.u32 2147483648, %v663_v57  ;;  %v673_v23 = vand.u32 2147483647, %v663_v57  ;;  %vm669_vm14 = vweird.f32 %v663_v57 }
 0x464   : > { %v676_v28 = vor.u32 1.1754944e-38, %v675_v19  ;;  %vm674_vm6 = vcmp.eq.f32.partialorder %v673_v23, 8.507059e+37  ;;  %v321_v19 = vld [vmem:[%s1839_s2 + $0x48] sm:$0xff] }
 0x468   : > { %v1282_v6 = vpop.eup %1281 }
 0x469   : > { %v665_v9 = vmul.f32 %v1282_v6, %v663_v57  ;;  %v470_v10 = vpop.permute.xlu2 %469  ;;  %vm670_vm12 = vweird.f32 %v1282_v6 }
 0x46a   : > { %v475_v13 = vsel %vm398_vm1, %v470_v10, 0  ;;  %vm671_vm4 = vmor %vm669_vm14, %vm670_vm12 }
 0x46b   : > { %v666_v17 = vsub.f32 1.0, %v665_v9  ;;  %484 = vmatpush.bf16.msrb.mxu0 %v475_v13 }
 0x46d   : > { %v667_v22 = vmul.f32 %v1282_v6, %v666_v17 }
 0x46e   : > { %1195 = vmatmul.msk.bf16.vlgmr.msrb.gmra.mxu0 %vm368_vm3, %v467_v21 }
 0x46f   : > { %600 = vmatpush.bf16.msra.mxu0 %v591_v16  ;;  %v668_v25 = vadd.f32 %v1282_v6, %v667_v22  ;;  %v337_v22 = vpack.c.bf16 %v321_v19, %v321_v19 }
 0x471   : > { %v672_v29 = vsel %vm671_vm4, %v1282_v6, %v668_v25  ;;  %v728_v48 = vpop.permute.xlu2 %727  ;;  %v800_v24 = vunpack.c.l.b16 %v337_v22 }
 0x472   : > { %v677_v32 = vsel %vm674_vm6, %v676_v28, %v672_v29  ;;  %v733_v51 = vsel %vm346_vm0, %v728_v48, 0 }
 0x473   : > { %718 = vmatpush.bf16.msrb.mxu0 %v706_v18  ;;  %v678_v34 = vmul.f32 %v1665_v37, %v677_v32  ;;  %v317_v37 = vld [vmem:[%s1839_s2 + $0x28] sm:$0xff]  ;;  %v320_v18 = vld [vmem:[%s1839_s2 + $0x40] sm:$0xff] }
 0x474   : > { %v333_v45 = vpack.c.bf16 %v317_v37, %v317_v37  ;;  %v336_v21 = vpack.c.bf16 %v320_v18, %v320_v18  ;;  %v323_v37 = vld [vmem:[%s1839_s2 + $0x58] sm:$0xff] }
 0x475   : > { %v679_v38 = vpack.c.bf16 %v678_v34, %v678_v34 }
 0x476   : > { %v610_v47 = vunpack.c.l.b16 %v333_v45  ;;  %v799_v23 = vunpack.c.l.b16 %v336_v21  ;;  %v894_v45 = vunpack.c.l.b16 %v338_v44 }
 0x477   : > { %1202 = vmatmul.msk.bf16.vlgmr.msra.gmra.mxu3 %vm368_vm3, %v679_v38 }
 0x478   : > { %v611_v31 = vpack.c.b16 %v610_v47, %v609_v46  ;;  %v801_v25 = vpack.c.b16 %v800_v24, %v799_v23 }
 0x479   : > { %v821_v59 = vpop.permute.xlu2 %820 }
 0x47a   : > { %623 = vmatpush.bf16.msra.mxu1 %v611_v31  ;;  %813 = vmatpush.bf16.msrb.mxu3 %v801_v25 }
 0x47e   : > { %1199 = vmatmul.msk.bf16.vlgmr.msra.gmra.mxu0 %vm368_vm3, %v584_v39 }
 0x47f   : > { %837 = vmatpush.bf16.xpose.msra.mxu0 %v828_v42 }
 0x4eb   : > { %v486_v49 = vpop.f32.mrf.mxu0 }
 0x4ec   : > { %v490_v50 = vpack.c.bf16 %v486_v49, %v486_v49 }
 0x4ee   : > { %1196 = vmatmul.msk.bf16.vlgmr.msrb.gmra.mxu1 %vm346_vm0, %v490_v50 }
 0x4ef   : > { %742 = vmatpush.bf16.xpose.msrb.mxu1 %v733_v51 }
 0x4f3   : > { %v488_v52 = vpop.f32.mrf.mxu0 }
 0x4fa   : > { %v697_v53 = vpop.f32.mrf.mxu3 }
 0x4fb   : > { %v701_v54 = vpack.c.bf16 %v697_v53, %v697_v53  ;;  %v602_v55 = vpop.f32.mrf.mxu0 }
 0x4fc   : > { %v606_v56 = vpack.c.bf16 %v602_v55, %v602_v55 }
 0x4fd   : > { %1203 = vmatmul.msk.bf16.vlgmr.msrb.gmra.mxu0 %vm346_vm0, %v701_v54 }
 0x4fe   : > { %1200 = vmatmul.msk.bf16.vlgmr.msra.gmra.mxu1 %vm346_vm0, %v606_v56 }
 0x502   : > { %v699_v57 = vpop.f32.mrf.mxu3 }
 0x503   : > { %v604_v58 = vpop.f32.mrf.mxu0 }
 0x50d   : > { %1207 = vmatmul.msk.bf16.vlgmr.msra.gmra.mxu0 %vm346_vm0, %v821_v59 }
 0x50e   : > { %1204 = vmatmul.msk.bf16.vlgmr.msrb.gmra.mxu1 %vm346_vm0, %v726_v60 }
 0x56b   : > { %v509_v61 = vpop.f32.mrf.mxu1 }
 0x56c   : > { %v532_v63 = vadd.f32 %v1648_v15, %v509_v61 }
 0x573   : > { %v511_v62 = vpop.f32.mrf.mxu1 }
 0x57a   : > { %v720_v0 = vpop.f32.mrf.mxu0 }
 0x57b   : > { %v625_v1 = vpop.f32.mrf.mxu1 }
 0x57c   : > { %v629_v2 = vadd.f32 %v625_v1, %v532_v63 }
 0x57e   : > { %v1724_v3 = vadd.f32 %v720_v0, %v629_v2 }
 0x582   : > { %v722_v4 = vpop.f32.mrf.mxu0 }
 0x583   : > { %v627_v5 = vpop.f32.mrf.mxu1 }
 0x58a   : > { %v839_v6 = vpop.f32.mrf.mxu0 }
 0x58b   : > { %v843_v7 = vmul.f32 0.25, %v839_v6  ;;  %v744_v8 = vpop.f32.mrf.mxu1 }
 0x58c   : > { %v748_v9 = vmul.f32 0.25, %v744_v8 }
 0x58d   : > { %v844_v10 = vsel %vm1622_vm2, %v843_v7, -inf }
 0x58e   : > { %v845_v11 = vsel %vm368_vm3, %v844_v10, -inf  ;;  %v749_v13 = vsel %vm1622_vm2, %v748_v9, -inf }
 0x58f   : > { %846 = vmax.xlane.f32.xlu1 %v845_v11  ;;  %v750_v15 = vsel %vm368_vm3, %v749_v13, -inf }
 0x590   : > { %751 = vmax.xlane.f32.xlu0 %v750_v15 }
 0x592   : > { %v841_v16 = vpop.f32.mrf.mxu0 }
 0x593   : > { %v746_v17 = vpop.f32.mrf.mxu1 }
 0x5a8   : > { %775 = vrot.lane.b32.xlu1 %v1616_v26, %s1367_s9  ;;  %s1369_s9 = smov 16  }
 0x5b0   : > { %917 = vrot.lane.b32.xlu1 %v1592_v12, %s1368_s30 }
 0x602   : > { %v847_v20 = vpop.xlane.xlu1 %846 }
 0x603   : > { %v848_v27 = vsub.f32 %v844_v10, %v847_v20  ;;  %v752_v28 = vpop.xlane.xlu0 %751 }
 0x604   : > { %v753_v29 = vsub.f32 %v749_v13, %v752_v28 }
 0x605   : > { %v849_v30 = vmul.f32 1.442695, %v848_v27 }
 0x606   : > { %v754_v32 = vmul.f32 1.442695, %v753_v29 }
 0x607   : > { %1283 = vpow2.f32 %v849_v30 }
 0x608   : > { %1285 = vpow2.f32 %v754_v32 }
 0x60d   : > { %v1284_v33 = vpop.eup %1283 }
 0x60e   : > { %v1286_v34 = vpop.eup %1285  ;;  %v851_v35 = vsel %vm368_vm3, %v1284_v33, 0.0 }
 0x60f   : > { %852 = vadd.xlane.f32.xlu0 %v851_v35  ;;  %v756_v38 = vsel %vm368_vm3, %v1286_v34, 0.0 }
 0x610   : > { %757 = vadd.xlane.f32.xlu2 %v756_v38 }
 0x61a   : > { %v776_v40 = vpop.permute.xlu1 %775 }
 0x61b   : > { %v781_v41 = vsel %vm398_vm1, %v776_v40, 0 }
 0x61c   : > { %790 = vmatpush.bf16.msrb.mxu2 %v781_v41 }
 0x622   : > { %v918_v39 = vpop.permute.xlu1 %917 }
 0x623   : > { %v923_v42 = vsel %vm346_vm0, %v918_v39, 0  ;;  %1012 = vrot.lane.b32.xlu0 %v1592_v12, %s1369_s9  ;;  %v339_v12 = vpack.c.bf16 %v323_v37, %v323_v37 }
 0x624   : > { %932 = vmatpush.bf16.xpose.msra.mxu3 %v923_v42 }
 0x625   : > { %v895_v46 = vunpack.c.l.b16 %v339_v12 }
 0x627   : > { %v896_v47 = vpack.c.b16 %v895_v46, %v894_v45 }
 0x628   : > { %870 = vrot.lane.b32.xlu2 %v1616_v26, %s1366_s8  ;;  %s1124_s8 = sshll.u32 %s188_s10, 4  ;;  %s1125_s8 = int_to_ptr.vmem [resolvable:$true] %s1124_s8 }
 0x629   : > { %908 = vmatpush.bf16.msra.mxu2 %v896_v47 }
 0x62b   : > { %1010 = vrot.lane.b32.xlu0 %v1600_v14, %s1369_s9 }
 0x630   : > { %915 = vrot.lane.b32.xlu2 %v1600_v14, %s1368_s30 }
 0x682   : > { %v853_v31 = vpop.xlane.xlu0 %852 }
 0x683   : > { %1287 = vrcp.f32 %v853_v31  ;;  %v758_v48 = vpop.xlane.xlu2 %757  ;;  %v865_v55 = vand.u32 2147483648, %v853_v31  ;;  %v863_v58 = vand.u32 2147483647, %v853_v31  ;;  %vm859_vm10 = vweird.f32 %v853_v31 }
 0x684   : > { %1289 = vrcp.f32 %v758_v48  ;;  %v770_v59 = vand.u32 2147483648, %v758_v48  ;;  %v768_v61 = vand.u32 2147483647, %v758_v48  ;;  %vm764_vm12 = vweird.f32 %v758_v48 }
 0x685   : > { %v866_v63 = vor.u32 1.1754944e-38, %v865_v55  ;;  %vm864_vm13 = vcmp.eq.f32.partialorder %v863_v58, 8.507059e+37 }
 0x686   : > { %v771_v2 = vor.u32 1.1754944e-38, %v770_v59  ;;  %vm769_vm15 = vcmp.eq.f32.partialorder %v768_v61, 8.507059e+37 }
 0x689   : > { %v1288_v49 = vpop.eup %1287 }
 0x68a   : > { %v1290_v14 = vpop.eup %1289  ;;  %v855_v50 = vmul.f32 %v1288_v49, %v853_v31  ;;  %vm860_vm8 = vweird.f32 %v1288_v49 }
 0x68b   : > { %v760_v51 = vmul.f32 %v1290_v14, %v758_v48  ;;  %v871_v52 = vpop.permute.xlu2 %870  ;;  %vm765_vm9 = vweird.f32 %v1290_v14  ;;  %vm861_vm11 = vmor %vm859_vm10, %vm860_vm8 }
 0x68c   : > { %v856_v53 = vsub.f32 1.0, %v855_v50  ;;  %v876_v54 = vsel %vm398_vm1, %v871_v52, 0  ;;  %vm766_vm14 = vmor %vm764_vm12, %vm765_vm9 }
 0x68d   : > { %v761_v56 = vsub.f32 1.0, %v760_v51  ;;  %885 = vmatpush.bf16.msra.mxu1 %v876_v54 }
 0x68e   : > { %v857_v57 = vmul.f32 %v1288_v49, %v856_v53 }
 0x68f   : > { %v762_v60 = vmul.f32 %v1290_v14, %v761_v56 }
 0x690   : > { %v858_v62 = vadd.f32 %v1288_v49, %v857_v57 }
 0x691   : > { %v763_v0 = vadd.f32 %v1290_v14, %v762_v60 }
 0x692   : > { %v862_v1 = vsel %vm861_vm11, %v1288_v49, %v858_v62 }
 0x693   : > { %v867_v4 = vsel %vm864_vm13, %v866_v63, %v862_v1  ;;  %v767_v5 = vsel %vm766_vm14, %v1290_v14, %v763_v0  ;;  %v916_v23 = vpop.permute.xlu2 %915 }
 0x694   : > { %v868_v6 = vmul.f32 %v1284_v33, %v867_v4  ;;  %v772_v7 = vsel %vm769_vm15, %v771_v2, %v767_v5 }
 0x695   : > { %v773_v8 = vmul.f32 %v1286_v34, %v772_v7  ;;  %v1013_v9 = vpop.permute.xlu0 %1012 }
 0x696   : > { %v869_v10 = vpack.c.bf16 %v868_v6, %v868_v6  ;;  %v1018_v13 = vsel %vm346_vm0, %v1013_v9, 0 }
 0x697   : > { %v774_v11 = vpack.c.bf16 %v773_v8, %v773_v8 }
 0x698   : > { %1208 = vmatmul.msk.bf16.vlgmr.msra.gmra.mxu1 %vm368_vm3, %v869_v10 }
 0x699   : > { %1205 = vmatmul.msk.bf16.vlgmr.msrb.gmra.mxu2 %vm368_vm3, %v774_v11 }
 0x69a   : > { %1027 = vmatpush.bf16.xpose.msrb.mxu2 %v1018_v13 }
 0x69d   : > { %v1011_v22 = vpop.permute.xlu0 %1010 }
 0x715   : > { %v887_v15 = vpop.f32.mrf.mxu1 }
 0x716   : > { %v891_v16 = vpack.c.bf16 %v887_v15, %v887_v15  ;;  %v326_v15 = vld [vmem:[%s1839_s2 + $0x70] sm:$0xff] }
 0x718   : > { %1209 = vmatmul.msk.bf16.vlgmr.msra.gmra.mxu2 %vm346_vm0, %v891_v16  ;;  %v327_v16 = vld [vmem:[%s1839_s2 + $0x78] sm:$0xff] }
 0x71c   : > { %v792_v17 = vpop.f32.mrf.mxu2 }
 0x71d   : > { %v796_v18 = vpack.c.bf16 %v792_v17, %v792_v17  ;;  %v889_v19 = vpop.f32.mrf.mxu1  ;;  %v342_v17 = vpack.c.bf16 %v326_v15, %v326_v15 }
 0x71e   : > { %v324_v19 = vld [vmem:[%s1839_s2 + $0x60] sm:$0xff] }
 0x71f   : > { %1206 = vmatmul.msk.bf16.vlgmr.msrb.gmra.mxu3 %vm346_vm0, %v796_v18  ;;  %v343_v18 = vpack.c.bf16 %v327_v16, %v327_v16 }
 0x724   : > { %v794_v21 = vpop.f32.mrf.mxu2 }
 0x725   : > { %v325_v21 = vld [vmem:[%s1839_s2 + $0x68] sm:$0xff] }
 0x728   : > { %1213 = vmatmul.msk.bf16.vlgmr.msrb.gmra.mxu2 %vm346_vm0, %v1011_v22  ;;  %v340_v22 = vpack.c.bf16 %v324_v19, %v324_v19 }
 0x72f   : > { %1210 = vmatmul.msk.bf16.vlgmr.msra.gmra.mxu3 %vm346_vm0, %v916_v23  ;;  %v341_v23 = vpack.c.bf16 %v325_v21, %v325_v21 }
 0x79b   : > { %v910_v24 = vpop.f32.mrf.mxu2 }
 0x7a2   : > { %v815_v20 = vpop.f32.mrf.mxu3 }
 0x7a3   : > { %v819_v25 = vadd.f32 %v815_v20, %v1724_v3  ;;  %v912_v27 = vpop.f32.mrf.mxu2  ;;  %v1085_v20 = vunpack.c.l.b16 %v343_v18 }
 0x7a4   : > { %v990_v27 = vunpack.c.l.b16 %v341_v23 }
 0x7a5   : > { %v1769_v28 = vadd.f32 %v910_v24, %v819_v25  ;;  %v1084_v24 = vunpack.c.l.b16 %v342_v17  ;;  %v989_v25 = vunpack.c.l.b16 %v340_v22 }
 0x7aa   : > { %v817_v29 = vpop.f32.mrf.mxu3 }
 0x7ab   : > { %v1029_v30 = vpop.f32.mrf.mxu2  ;;  %v1086_v29 = vpack.c.b16 %v1085_v20, %v1084_v24 }
 0x7ac   : > { %v1033_v32 = vmul.f32 0.25, %v1029_v30  ;;  %v991_v30 = vpack.c.b16 %v990_v27, %v989_v25 }
 0x7ae   : > { %v1034_v33 = vsel %vm1622_vm2, %v1033_v32, -inf  ;;  %1003 = vmatpush.bf16.msrb.mxu1 %v991_v30 }
 0x7af   : > { %v1035_v34 = vsel %vm368_vm3, %v1034_v33, -inf }
 0x7b0   : > { %1036 = vmax.xlane.f32.xlu1 %v1035_v34 }
 0x7b2   : > { %v934_v35 = vpop.f32.mrf.mxu3 }
 0x7b3   : > { %v938_v38 = vmul.f32 0.25, %v934_v35  ;;  %v1031_v40 = vpop.f32.mrf.mxu2 }
 0x7b5   : > { %v939_v41 = vsel %vm1622_vm2, %v938_v38, -inf }
 0x7b6   : > { %v940_v3 = vsel %vm368_vm3, %v939_v41, -inf }
 0x7b7   : > { %941 = vmax.xlane.f32.xlu0 %v940_v3 }
 0x7ba   : > { %v936_v39 = vpop.f32.mrf.mxu3 }
 0x7cb   : > { %1060 = vrot.lane.b32.xlu0 %v1616_v26, %s1369_s9 }
 0x823   : > { %v1037_v42 = vpop.xlane.xlu1 %1036 }
 0x824   : > { %v1038_v43 = vsub.f32 %v1034_v33, %v1037_v42  ;;  %v1266_v42 = vld [vmem:[%s1840_s3] ss:$0 sm:$0xff] }
 0x826   : > { %v1039_v37 = vmul.f32 1.442695, %v1038_v43 }
 0x828   : > { %1291 = vpow2.f32 %v1039_v37 }
 0x82a   : > { %v942_v44 = vpop.xlane.xlu0 %941 }
 0x82b   : > { %v943_v12 = vsub.f32 %v939_v41, %v942_v44 }
 0x82d   : > { %v944_v45 = vmul.f32 1.442695, %v943_v12 }
 0x82e   : > { %v1292_v46 = vpop.eup %1291 }
 0x82f   : > { %1293 = vpow2.f32 %v944_v45  ;;  %v1041_v47 = vsel %vm368_vm3, %v1292_v46, 0.0 }
 0x830   : > { %1042 = vadd.xlane.f32.xlu2 %v1041_v47 }
 0x835   : > { %v1294_v36 = vpop.eup %1293 }
 0x836   : > { %v946_v31 = vsel %vm368_vm3, %v1294_v36, 0.0 }
 0x837   : > { %947 = vadd.xlane.f32.xlu1 %v946_v31 }
 0x83d   : > { %v1061_v48 = vpop.permute.xlu0 %1060 }
 0x83e   : > { %v1066_v49 = vsel %vm398_vm1, %v1061_v48, 0 }
 0x83f   : > { %1075 = vmatpush.bf16.msrb.mxu3 %v1066_v49 }
 0x848   : > { %965 = vrot.lane.b32.xlu2 %v1616_v26, %s1368_s30 }
 0x8a3   : > { %v1043_v14 = vpop.xlane.xlu2 %1042 }
 0x8a4   : > { %1295 = vrcp.f32 %v1043_v14  ;;  %v1055_v56 = vand.u32 2147483648, %v1043_v14  ;;  %v1053_v58 = vand.u32 2147483647, %v1043_v14  ;;  %vm1049_vm4 = vweird.f32 %v1043_v14 }
 0x8a6   : > { %v1056_v26 = vor.u32 1.1754944e-38, %v1055_v56  ;;  %vm1054_vm6 = vcmp.eq.f32.partialorder %v1053_v58, 8.507059e+37 }
 0x8aa   : > { %v1296_v50 = vpop.eup %1295  ;;  %v948_v51 = vpop.xlane.xlu1 %947 }
 0x8ab   : > { %v1045_v52 = vmul.f32 %v1296_v50, %v1043_v14  ;;  %1297 = vrcp.f32 %v948_v51  ;;  %v966_v53 = vpop.permute.xlu2 %965  ;;  %vm1050_vm2 = vweird.f32 %v1296_v50  ;;  %v960_v2 = vand.u32 2147483648, %v948_v51 }
 0x8ac   : > { %v971_v54 = vsel %vm398_vm1, %v966_v53, 0  ;;  %vm1051_vm5 = vmor %vm1049_vm4, %vm1050_vm2  ;;  %v958_v5 = vand.u32 2147483647, %v948_v51  ;;  %vm954_vm7 = vweird.f32 %v948_v51 }
 0x8ad   : > { %v1046_v55 = vsub.f32 1.0, %v1045_v52  ;;  %980 = vmatpush.bf16.msrb.mxu0 %v971_v54  ;;  %v961_v8 = vor.u32 1.1754944e-38, %v960_v2 }
 0x8ae   : > { %vm959_vm9 = vcmp.eq.f32.partialorder %v958_v5, 8.507059e+37 }
 0x8af   : > { %v1047_v57 = vmul.f32 %v1296_v50, %v1046_v55 }
 0x8b1   : > { %v1298_v59 = vpop.eup %1297  ;;  %v1048_v60 = vadd.f32 %v1296_v50, %v1047_v57  ;;  %1098 = vmatpush.bf16.msra.mxu0 %v1086_v29 }
 0x8b2   : > { %v950_v61 = vmul.f32 %v1298_v59, %v948_v51  ;;  %vm955_vm1 = vweird.f32 %v1298_v59 }
 0x8b3   : > { %v1052_v62 = vsel %vm1051_vm5, %v1296_v50, %v1048_v60  ;;  %vm956_vm8 = vmor %vm954_vm7, %vm955_vm1 }
 0x8b4   : > { %v1057_v63 = vsel %vm1054_vm6, %v1056_v26, %v1052_v62  ;;  %v951_v0 = vsub.f32 1.0, %v950_v61 }
 0x8b5   : > { %v1058_v1 = vmul.f32 %v1292_v46, %v1057_v63 }
 0x8b6   : > { %v952_v4 = vmul.f32 %v1298_v59, %v951_v0 }
 0x8b7   : > { %v1059_v6 = vpack.c.bf16 %v1058_v1, %v1058_v1 }
 0x8b8   : > { %v953_v7 = vadd.f32 %v1298_v59, %v952_v4 }
 0x8b9   : > { %1214 = vmatmul.msk.bf16.vlgmr.msrb.gmra.mxu3 %vm368_vm3, %v1059_v6 }
 0x8ba   : > { %v957_v9 = vsel %vm956_vm8, %v1298_v59, %v953_v7 }
 0x8bb   : > { %v962_v10 = vsel %vm959_vm9, %v961_v8, %v957_v9 }
 0x8bc   : > { %v963_v11 = vmul.f32 %v1294_v36, %v962_v10 }
 0x8be   : > { %v964_v13 = vpack.c.bf16 %v963_v11, %v963_v11 }
 0x8c0   : > { %1211 = vmatmul.msk.bf16.vlgmr.msrb.gmra.mxu0 %vm368_vm3, %v964_v13 }
 0x93c   : > { %v1077_v32 = vpop.f32.mrf.mxu3 }
 0x93d   : > { %v1081_v33 = vpack.c.bf16 %v1077_v32, %v1077_v32  ;;  %v982_v34 = vpop.f32.mrf.mxu0 }
 0x93e   : > { %v986_v35 = vpack.c.bf16 %v982_v34, %v982_v34 }
 0x93f   : > { %1215 = vmatmul.msk.bf16.vlgmr.msra.gmra.mxu0 %vm346_vm0, %v1081_v33 }
 0x940   : > { %1212 = vmatmul.msk.bf16.vlgmr.msrb.gmra.mxu1 %vm346_vm0, %v986_v35 }
 0x944   : > { %v1079_v38 = vpop.f32.mrf.mxu3 }
 0x945   : > { %v984_v40 = vpop.f32.mrf.mxu0 }
 0x9bc   : > { %v1100_v41 = vpop.f32.mrf.mxu0 }
 0x9bd   : > { %v1005_v3 = vpop.f32.mrf.mxu1 }
 0x9be   : > { %v1009_v39 = vadd.f32 %v1005_v3, %v1769_v28 }
 0x9c0   : > { %v1104_v43 = vadd.f32 %v1100_v41, %v1009_v39 }
 0x9c2   : > { %v1109_v37 = vadd.f32 %v1266_v42, %v1104_v43 }
 0x9c4   : > { %v1102_v44 = vpop.f32.mrf.mxu0  ;;  %1110 = vst [vmem:[%s188_s10] sm:$0xff] %v1109_v37 }
 0x9c5   : > { %v1007_v12 = vpop.f32.mrf.mxu1 }
 0x9c6   : > { %1326 = shalt.err (!%p1323_p3)
}
 0x9c7   : > { %1220 = dma.vmem_to_hbm [thread:$0]  (%p1433_p5), %s1125_s8, 128, %s1127_s20, %s1112_s19  }
 0x9c8 PF: > { %p1226_p4 = scmp.ge.s32.totalorder %s1361_s18, 2  ;;  %s1138_s5 = sand.u32 1, %s1349_s15  }
 0x9c9   : > { %s1139_s6 = scalar_lea.sflag [#allocation3], %s1138_s5 }
 0x9ca   : > { %p1223_p7 = pnand %p1226_p4, %p1437_p6 }
 0x9cc   : > { %p1224_p8 = pneg %p1223_p7 }
 0x9ce   : > { %1344 = dma.done.wait (%p1224_p8), %s1139_s6, 128  }
 0x9cf   : > { %1346 = vsyncadd (%p1224_p8), %s1139_s6, 4294967168  ;;  %p14_p9 = scmp.ge.s32.totalorder %s1420_s21, 4   ;;  %s1846_s15 = smov %s1353_s16 }
 0x9d0   : > { %s1847_s16 = smov %s1357_s17  ;;  %s1848_s17 = smov %s1431_s24 }
 0x9d1   : > { %s1849_s18 = smov %s1420_s21  ;;  %16 = sbr.rel (!%p14_p9) target bundleno = 3 (0x3), region = 71 }
 0x9d6   :  { %1145 = vsyncpa [#allocation3], 1 }
 0x9d7   :  { %1147 = vsyncpa [#allocation3 + $0x1], 1 }

</bundles_post_ra>
